<compile_context>
chip_gen: v7x
topology: tpu7x:2x2x1
jax: 0.10.0
libtpu: 0.0.40
codegen_flags: <defaults>
</compile_context>

<pallas_src>
import math
from functools import partial

import jax
import jax.numpy as jnp
from jax.experimental import pallas as pl
from jax.experimental.pallas import tpu as pltpu


# ----------------------------- tiling helpers ------------------------------

_TM_CAP, _TN_CAP, _TK_CAP = 128, 256, 512   # safe on v7x's 64 MiB VMEM too
_FUSED_MAX_BATCH = 128                      # fused path: all data VMEM-resident

_MATMUL_COMPILER_PARAMS = pltpu.CompilerParams(
    dimension_semantics=("parallel", "parallel", "arbitrary"),
    vmem_limit_bytes=32 * 1024 * 1024,
)


def _round_up(x: int, m: int) -> int:
    return ((x + m - 1) // m) * m


def _pick_tile(dim: int, cap: int, align: int) -> int:
    """Largest `align`-multiple tile <= cap dividing `dim`, else the full dim.

    Full-dim blocks are exempt from the (8, 128) alignment rule, so small or
    ragged dims collapse to a single block.
    """
    if dim <= cap or dim % align != 0:
        return dim
    t = (cap // align) * align
    while t >= align:
        if dim % t == 0:
            return t
        t -= align
    return dim


def _pad_atom_blocks(arr, out_dim, atom_size, atom_pad):
    """(..., out_dim*atom_size) -> (..., out_dim*atom_pad), zero-pad per action.

    Lane-aligns each action's atom block so in-kernel slices start at a
    multiple of 128 lanes.
    """
    if atom_pad == atom_size:
        return arr
    lead = arr.shape[:-1]
    a = arr.reshape(lead + (out_dim, atom_size))
    pad = [(0, 0)] * (a.ndim - 1) + [(0, atom_pad - atom_size)]
    a = jnp.pad(a, pad)
    return a.reshape(lead + (out_dim * atom_pad,))


# ----------------------- dueling / softmax head math ------------------------


def _dueling_softmax_columns(adv_full, value, support_row, *, out_dim,
                             atom_size, atom_pad):
    """Per-action dueling + categorical-softmax expectation.

    adv_full: (b, out_dim*atom_pad) with lane-aligned per-action atom blocks.
    value:    (b, atom_size).   support_row: (1, atom_size).
    Returns a list of `out_dim` (b, 1) q-value columns.
    """
    adv = [adv_full[:, a * atom_pad:a * atom_pad + atom_size]
           for a in range(out_dim)]
    adv_mean = adv[0]
    for a in range(1, out_dim):
        adv_mean = adv_mean + adv[a]
    adv_mean = adv_mean * (1.0 / out_dim)

    cols = []
    for a in range(out_dim):
        q_atoms = value + adv[a] - adv_mean
        m = jnp.max(q_atoms, axis=-1, keepdims=True)
        e = jnp.exp(q_atoms - m)
        s = jnp.sum(e, axis=-1, keepdims=True)
        dist = jnp.maximum(e / s, 0.001)          # clamp(min=0.001), as in torch
        cols.append(jnp.sum(dist * support_row, axis=-1, keepdims=True))
    return cols


# --------------------- fused whole-network kernel (small B) -----------------


def _fused_network_kernel(
        x_ref, fw_ref, fb_ref,
        ah_wmu, ah_wsig, ah_ein, ah_eout, ah_b,
        vh_wmu, vh_wsig, vh_ein, vh_eout, vh_b,
        a_wmu, a_wsig, a_ein, a_eout, a_b,
        v_wmu, v_wsig, v_ein, v_eout, v_b,
        sup_ref, q_ref, *, out_dim, atom_size, atom_pad):
    """Entire Rainbow forward in one VMEM-resident kernel."""

    def noisy(h, wmu, wsig, ein, eout, b):
        # Factorized-noise identity: h @ (Wmu + Wsig * ein eout^T) + b
        #   == h @ Wmu + ((h * ein) @ Wsig) * eout + b
        mu = jnp.dot(h, wmu[...], preferred_element_type=jnp.float32)
        sg = jnp.dot(h * ein[...], wsig[...],
                     preferred_element_type=jnp.float32)
        return mu + sg * eout[...] + b[...]

    feat = jnp.dot(x_ref[...], fw_ref[...],
                   preferred_element_type=jnp.float32) + fb_ref[...]
    feat = jnp.maximum(feat, 0.0)

    adv_hid = jnp.maximum(noisy(feat, ah_wmu, ah_wsig, ah_ein, ah_eout, ah_b), 0.0)
    val_hid = jnp.maximum(noisy(feat, vh_wmu, vh_wsig, vh_ein, vh_eout, vh_b), 0.0)

    adv_full = noisy(adv_hid, a_wmu, a_wsig, a_ein, a_eout, a_b)  # (B, A*atom_pad)
    value = noisy(val_hid, v_wmu, v_wsig, v_ein, v_eout, v_b)     # (B, atom_size)

    cols = _dueling_softmax_columns(adv_full, value, sup_ref[...],
                                    out_dim=out_dim, atom_size=atom_size,
                                    atom_pad=atom_pad)
    for a in range(out_dim):
        q_ref[:, a:a + 1] = cols[a].astype(q_ref.dtype)


def network_forward_fused(params, noise, support, x, out_dim, atom_size):
    B = x.shape[0]
    atom_pad = _round_up(atom_size, 128)

    def prep(name, pad=False):
        p, n = params[name], noise[name]
        wmu, wsig = p["weight_mu_t"], p["weight_sigma_t"]
        eout = n["eps_out"]
        b_eff = p["bias_mu"] + p["bias_sigma"] * eout      # folded bias (cheap)
        if pad:
            wmu = _pad_atom_blocks(wmu, out_dim, atom_size, atom_pad)
            wsig = _pad_atom_blocks(wsig, out_dim, atom_size, atom_pad)
            eout = _pad_atom_blocks(eout, out_dim, atom_size, atom_pad)
            b_eff = _pad_atom_blocks(b_eff, out_dim, atom_size, atom_pad)
        return (wmu, wsig, n["eps_in"].reshape(1, -1),
                eout.reshape(1, -1), b_eff.reshape(1, -1))

    args = (
        x, params["feat_w"], params["feat_b"].reshape(1, -1),
        *prep("adv_hid"), *prep("val_hid"),
        *prep("adv", pad=True), *prep("val"),
        support.reshape(1, atom_size),
    )

    return pl.pallas_call(
        partial(_fused_network_kernel, out_dim=out_dim, atom_size=atom_size,
                atom_pad=atom_pad),
        out_shape=jax.ShapeDtypeStruct((B, out_dim), jnp.float32),
        compiler_params=pltpu.CompilerParams(
            vmem_limit_bytes=32 * 1024 * 1024),
    )(*args)


# -------------------- tiled per-layer kernels (large batch) -----------------


def _linear_kernel(x_ref, w_ref, b_ref, o_ref, acc_ref, *, apply_relu):
    k = pl.program_id(2)

    @pl.when(k == 0)
    def _():
        acc_ref[...] = jnp.zeros_like(acc_ref)

    acc_ref[...] += jnp.dot(x_ref[...], w_ref[...],
                            preferred_element_type=jnp.float32)

    @pl.when(k == pl.num_programs(2) - 1)
    def _():
        y = acc_ref[...] + b_ref[...]
        if apply_relu:
            y = jnp.maximum(y, 0.0)
        o_ref[...] = y.astype(o_ref.dtype)


def _noisy_linear_kernel(x_ref, wmu_ref, wsig_ref, ein_ref, eout_ref, b_ref,
                         o_ref, acc_ref, *, apply_relu):
    k = pl.program_id(2)

    @pl.when(k == 0)
    def _():
        acc_ref[...] = jnp.zeros_like(acc_ref)

    x = x_ref[...]
    # identity: no O(tk*tn) weight reconstruction, two MXU dots instead.
    mu = jnp.dot(x, wmu_ref[...], preferred_element_type=jnp.float32)
    sg = jnp.dot(x * ein_ref[...], wsig_ref[...],
                 preferred_element_type=jnp.float32)
    acc_ref[...] += mu + sg * eout_ref[...]

    @pl.when(k == pl.num_programs(2) - 1)
    def _():
        y = acc_ref[...] + b_ref[...]
        if apply_relu:
            y = jnp.maximum(y, 0.0)
        o_ref[...] = y.astype(o_ref.dtype)


def _weight_spec(tk, tn, n_k_steps):
    kwargs = {}
    if n_k_steps >= 3:
        # Hide exposed weight-DMA latency when there are many K tiles.
        kwargs["pipeline_mode"] = pl.Buffered(3)
    return pl.BlockSpec((tk, tn), lambda i, j, k: (k, j), **kwargs)


def linear(x, w, b, *, apply_relu=False):
    """y = relu?(x @ w + b).  x: (B, K), w: (K, N), b: (N,)."""
    B, K = x.shape
    _, N = w.shape
    tm = _pick_tile(B, _TM_CAP, 8)
    tn = _pick_tile(N, _TN_CAP, 128)
    tk = _pick_tile(K, _TK_CAP, 128)
    grid = (B // tm, N // tn, K // tk)

    return pl.pallas_call(
        partial(_linear_kernel, apply_relu=apply_relu),
        out_shape=jax.ShapeDtypeStruct((B, N), x.dtype),
        grid_spec=pltpu.PrefetchScalarGridSpec(
            num_scalar_prefetch=0,
            grid=grid,
            in_specs=[
                pl.BlockSpec((tm, tk), lambda i, j, k: (i, k)),   # x
                _weight_spec(tk, tn, grid[2]),                    # w (in, out)
                pl.BlockSpec((1, tn), lambda i, j, k: (0, j)),    # bias
            ],
            out_specs=pl.BlockSpec((tm, tn), lambda i, j, k: (i, j)),
            scratch_shapes=[pltpu.VMEM((tm, tn), jnp.float32)],
        ),
        compiler_params=_MATMUL_COMPILER_PARAMS,
    )(x, w, b.reshape(1, N))


def noisy_linear(x, weight_mu_t, weight_sigma_t, eps_in, eps_out,
                 bias_mu, bias_sigma, *, apply_relu=False):
    """NoisyNet linear via the factorized-noise identity (no w_eff in HBM)."""
    B, K = x.shape
    _, N = weight_mu_t.shape
    tm = _pick_tile(B, _TM_CAP, 8)
    tn = _pick_tile(N, _TN_CAP, 128)
    tk = _pick_tile(K, _TK_CAP, 128)
    grid = (B // tm, N // tn, K // tk)

    b_eff = (bias_mu + bias_sigma * eps_out).reshape(1, N)

    return pl.pallas_call(
        partial(_noisy_linear_kernel, apply_relu=apply_relu),
        out_shape=jax.ShapeDtypeStruct((B, N), x.dtype),
        grid_spec=pltpu.PrefetchScalarGridSpec(
            num_scalar_prefetch=0,
            grid=grid,
            in_specs=[
                pl.BlockSpec((tm, tk), lambda i, j, k: (i, k)),   # x
                _weight_spec(tk, tn, grid[2]),                    # W_mu  (in,out)
                _weight_spec(tk, tn, grid[2]),                    # W_sig (in,out)
                pl.BlockSpec((1, tk), lambda i, j, k: (0, k)),    # eps_in row
                pl.BlockSpec((1, tn), lambda i, j, k: (0, j)),    # eps_out row
                pl.BlockSpec((1, tn), lambda i, j, k: (0, j)),    # folded bias
            ],
            out_specs=pl.BlockSpec((tm, tn), lambda i, j, k: (i, j)),
            scratch_shapes=[pltpu.VMEM((tm, tn), jnp.float32)],
        ),
        compiler_params=_MATMUL_COMPILER_PARAMS,
    )(x, weight_mu_t, weight_sigma_t, eps_in.reshape(1, K),
      eps_out.reshape(1, N), b_eff)


def _dueling_head_kernel(adv_ref, val_ref, sup_ref, q_ref, *, out_dim,
                         atom_size, atom_pad):
    cols = _dueling_softmax_columns(adv_ref[...], val_ref[...], sup_ref[...],
                                    out_dim=out_dim, atom_size=atom_size,
                                    atom_pad=atom_pad)
    for a in range(out_dim):
        q_ref[:, a:a + 1] = cols[a].astype(q_ref.dtype)


def dueling_head(adv_padded, value, support, *, out_dim, atom_size, atom_pad):
    """adv_padded: (B, out_dim*atom_pad), value: (B, atom_size) -> q: (B, out_dim)."""
    B = adv_padded.shape[0]
    tm = _pick_tile(B, _TM_CAP, 8)
    return pl.pallas_call(
        partial(_dueling_head_kernel, out_dim=out_dim, atom_size=atom_size,
                atom_pad=atom_pad),
        out_shape=jax.ShapeDtypeStruct((B, out_dim), jnp.float32),
        grid=(B // tm,),
        in_specs=[
            pl.BlockSpec((tm, out_dim * atom_pad), lambda i: (i, 0)),
            pl.BlockSpec((tm, atom_size), lambda i: (i, 0)),
            pl.BlockSpec((1, atom_size), lambda i: (0, 0)),
        ],
        out_specs=pl.BlockSpec((tm, out_dim), lambda i: (i, 0)),
        compiler_params=pltpu.CompilerParams(
            dimension_semantics=("parallel",)),
    )(adv_padded, value, support.reshape(1, atom_size))


def network_forward_tiled(params, noise, support, x, out_dim, atom_size):
    atom_pad = _round_up(atom_size, 128)

    def nl(name, h, relu, pad=False):
        p, n = params[name], noise[name]
        wmu, wsig = p["weight_mu_t"], p["weight_sigma_t"]
        eout, bmu, bsig = n["eps_out"], p["bias_mu"], p["bias_sigma"]
        if pad:
            wmu = _pad_atom_blocks(wmu, out_dim, atom_size, atom_pad)
            wsig = _pad_atom_blocks(wsig, out_dim, atom_size, atom_pad)
            eout = _pad_atom_blocks(eout, out_dim, atom_size, atom_pad)
            bmu = _pad_atom_blocks(bmu, out_dim, atom_size, atom_pad)
            bsig = _pad_atom_blocks(bsig, out_dim, atom_size, atom_pad)
        return noisy_linear(h, wmu, wsig, n["eps_in"], eout, bmu, bsig,
                            apply_relu=relu)

    feat = linear(x, params["feat_w"], params["feat_b"], apply_relu=True)
    adv_hid = nl("adv_hid", feat, True)
    val_hid = nl("val_hid", feat, True)
    adv = nl("adv", adv_hid, False, pad=True)        # (B, out_dim*atom_pad)
    value = nl("val", val_hid, False)                # (B, atom_size)
    return dueling_head(adv, value, support, out_dim=out_dim,
                        atom_size=atom_size, atom_pad=atom_pad)


def network_forward(params, noise, support, x, out_dim, atom_size):
    if x.shape[0] <= _FUSED_MAX_BATCH:
        return network_forward_fused(params, noise, support, x, out_dim,
                                     atom_size)
    return network_forward_tiled(params, noise, support, x, out_dim, atom_size)


# --------------------- parameter / noise init (plain JAX glue) ---------------


def scale_noise(key, size):
    z = jax.random.normal(key, (size,), dtype=jnp.float32)
    return jnp.sign(z) * jnp.sqrt(jnp.abs(z))


def init_noisy_linear(key, in_features, out_features, std_init=0.6):
    k_wmu, k_bmu = jax.random.split(key)
    mu_range = 1.0 / math.sqrt(in_features)
    # Stored transposed: (in, out).
    weight_mu_t = jax.random.uniform(k_wmu, (in_features, out_features),
                                     jnp.float32, -mu_range, mu_range)
    bias_mu = jax.random.uniform(k_bmu, (out_features,), jnp.float32,
                                 -mu_range, mu_range)
    weight_sigma_t = jnp.full((in_features, out_features),
                              std_init / math.sqrt(in_features), jnp.float32)
    bias_sigma = jnp.full((out_features,),
                          std_init / math.sqrt(out_features), jnp.float32)
    return dict(weight_mu_t=weight_mu_t, weight_sigma_t=weight_sigma_t,
                bias_mu=bias_mu, bias_sigma=bias_sigma)


def reset_noise(key, in_features, out_features):
    k_in, k_out = jax.random.split(key)
    return dict(eps_in=scale_noise(k_in, in_features),
                eps_out=scale_noise(k_out, out_features))


def init_network(key, in_dim, out_dim, atom_size, hidden=128):
    keys = jax.random.split(key, 10)
    mu_range = 1.0 / math.sqrt(in_dim)
    feat_w = jax.random.uniform(keys[0], (in_dim, hidden), jnp.float32,
                                -mu_range, mu_range)
    feat_b = jax.random.uniform(keys[1], (hidden,), jnp.float32,
                                -mu_range, mu_range)
    params = dict(
        feat_w=feat_w, feat_b=feat_b,
        adv_hid=init_noisy_linear(keys[2], hidden, hidden),
        adv=init_noisy_linear(keys[3], hidden, out_dim * atom_size),
        val_hid=init_noisy_linear(keys[4], hidden, hidden),
        val=init_noisy_linear(keys[5], hidden, atom_size),
    )
    noise = dict(
        adv_hid=reset_noise(keys[6], hidden, hidden),
        adv=reset_noise(keys[7], hidden, out_dim * atom_size),
        val_hid=reset_noise(keys[8], hidden, hidden),
        val=reset_noise(keys[9], hidden, atom_size),
    )
    return params, noise


# ------------------------------ pure-JAX reference --------------------------


def network_forward_ref(params, noise, support, x, out_dim, atom_size):
    """Pure-JAX reference of the PyTorch Network.forward semantics."""
    hi = jax.lax.Precision.HIGHEST

    def nl_ref(name, h):
        p, n = params[name], noise[name]
        w_eff = p["weight_mu_t"] + p["weight_sigma_t"] * jnp.outer(
            n["eps_in"], n["eps_out"])
        b_eff = p["bias_mu"] + p["bias_sigma"] * n["eps_out"]
        return jnp.dot(h, w_eff, precision=hi) + b_eff

    feat = jax.nn.relu(jnp.dot(x, params["feat_w"], precision=hi)
                       + params["feat_b"])
    adv_hid = jax.nn.relu(nl_ref("adv_hid", feat))
    val_hid = jax.nn.relu(nl_ref("val_hid", feat))
    advantage = nl_ref("adv", adv_hid).reshape(-1, out_dim, atom_size)
    value = nl_ref("val", val_hid).reshape(-1, 1, atom_size)
    q_atoms = value + advantage - advantage.mean(axis=1, keepdims=True)
    dist = jax.nn.softmax(q_atoms, axis=-1)
    dist = jnp.maximum(dist, 0.001)
    return jnp.sum(dist * support, axis=2)


# ---------------------------------- demo -------------------------------------

if __name__ == "__main__":
    key = jax.random.PRNGKey(0)
    k_params, k_x, k_xb = jax.random.split(key, 3)

    batch, in_dim, out_dim, atom_size, hidden = 8, 16, 4, 51, 128
    support = jnp.linspace(-10.0, 10.0, atom_size, dtype=jnp.float32)

    params, noise = init_network(k_params, in_dim, out_dim, atom_size, hidden)
    fwd = jax.jit(partial(network_forward, out_dim=out_dim,
                          atom_size=atom_size))

    # Small batch -> fully fused single-kernel path.
    x = jax.random.normal(k_x, (batch, in_dim), dtype=jnp.float32)
    q = jax.block_until_ready(fwd(params, noise, support, x))
    q_ref = network_forward_ref(params, noise, support, x, out_dim, atom_size)
    assert q.shape == (batch, out_dim)
    assert jnp.allclose(q, q_ref, atol=1e-3, rtol=1e-3), float(
        jnp.max(jnp.abs(q - q_ref)))

    # Training-scale batch -> tiled per-layer path (multiple M tiles).
    xb = jax.random.normal(k_xb, (256, in_dim), dtype=jnp.float32)
    qb = jax.block_until_ready(fwd(params, noise, support, xb))
    qb_ref = network_forward_ref(params, noise, support, xb, out_dim, atom_size)
    assert qb.shape == (256, out_dim)
    assert jnp.allclose(qb, qb_ref, atol=1e-3, rtol=1e-3), float(
        jnp.max(jnp.abs(qb - qb_ref)))

    print("KERNEL_OK")
</pallas_src>

<mosaic_0001>
module attributes {stable_mosaic.version = 11 : i64} {
  func.func @_fused_network_kernel(%arg0: memref<8x16xf32, #tpu.memory_space<vmem>>, %arg1: memref<16x128xf32, #tpu.memory_space<vmem>>, %arg2: memref<1x128xf32, #tpu.memory_space<vmem>>, %arg3: memref<128x128xf32, #tpu.memory_space<vmem>>, %arg4: memref<128x128xf32, #tpu.memory_space<vmem>>, %arg5: memref<1x128xf32, #tpu.memory_space<vmem>>, %arg6: memref<1x128xf32, #tpu.memory_space<vmem>>, %arg7: memref<1x128xf32, #tpu.memory_space<vmem>>, %arg8: memref<128x128xf32, #tpu.memory_space<vmem>>, %arg9: memref<128x128xf32, #tpu.memory_space<vmem>>, %arg10: memref<1x128xf32, #tpu.memory_space<vmem>>, %arg11: memref<1x128xf32, #tpu.memory_space<vmem>>, %arg12: memref<1x128xf32, #tpu.memory_space<vmem>>, %arg13: memref<128x512xf32, #tpu.memory_space<vmem>>, %arg14: memref<128x512xf32, #tpu.memory_space<vmem>>, %arg15: memref<1x128xf32, #tpu.memory_space<vmem>>, %arg16: memref<1x512xf32, #tpu.memory_space<vmem>>, %arg17: memref<1x512xf32, #tpu.memory_space<vmem>>, %arg18: memref<128x51xf32, #tpu.memory_space<vmem>>, %arg19: memref<128x51xf32, #tpu.memory_space<vmem>>, %arg20: memref<1x128xf32, #tpu.memory_space<vmem>>, %arg21: memref<1x51xf32, #tpu.memory_space<vmem>>, %arg22: memref<1x51xf32, #tpu.memory_space<vmem>>, %arg23: memref<1x51xf32, #tpu.memory_space<vmem>>, %arg24: memref<8x4xf32, #tpu.memory_space<vmem>>) attributes {dimension_semantics = [], scalar_prefetch = 0 : i64, scratch_operands = 0 : i64, tpu.core_type = #tpu.core_type<tc>} {
    %c0 = arith.constant 0 : index
    %c0_0 = arith.constant 0 : index
    %0 = vector.load %arg0[%c0, %c0_0] : memref<8x16xf32, #tpu.memory_space<vmem>>, vector<8x16xf32>
    %c0_1 = arith.constant 0 : index
    %c0_2 = arith.constant 0 : index
    %1 = vector.load %arg1[%c0_1, %c0_2] : memref<16x128xf32, #tpu.memory_space<vmem>>, vector<16x128xf32>
    %cst = arith.constant dense<0.000000e+00> : vector<8x128xf32>
    %2 = tpu.matmul %0, %1, %cst {dimension_numbers = #tpu.dot_dimension_numbers<[1], [0], [0], [1], [0, 0, 1, 1], [], []>} : vector<8x16xf32>, vector<16x128xf32>, vector<8x128xf32> -> vector<8x128xf32>
    %c0_3 = arith.constant 0 : index
    %c0_4 = arith.constant 0 : index
    %3 = vector.load %arg2[%c0_3, %c0_4] : memref<1x128xf32, #tpu.memory_space<vmem>>, vector<1x128xf32>
    %4 = vector.broadcast %3 : vector<1x128xf32> to vector<8x128xf32>
    %5 = arith.addf %2, %4 : vector<8x128xf32>
    %cst_5 = arith.constant 0.000000e+00 : f32
    %6 = vector.broadcast %cst_5 : f32 to vector<8x128xf32>
    %7 = arith.maximumf %5, %6 : vector<8x128xf32>
    %c0_6 = arith.constant 0 : index
    %c0_7 = arith.constant 0 : index
    %8 = vector.load %arg3[%c0_6, %c0_7] : memref<128x128xf32, #tpu.memory_space<vmem>>, vector<128x128xf32>
    %cst_8 = arith.constant dense<0.000000e+00> : vector<8x128xf32>
    %9 = tpu.matmul %7, %8, %cst_8 {dimension_numbers = #tpu.dot_dimension_numbers<[1], [0], [0], [1], [0, 0, 1, 1], [], []>} : vector<8x128xf32>, vector<128x128xf32>, vector<8x128xf32> -> vector<8x128xf32>
    %c0_9 = arith.constant 0 : index
    %c0_10 = arith.constant 0 : index
    %10 = vector.load %arg5[%c0_9, %c0_10] : memref<1x128xf32, #tpu.memory_space<vmem>>, vector<1x128xf32>
    %11 = vector.broadcast %10 : vector<1x128xf32> to vector<8x128xf32>
    %12 = arith.mulf %7, %11 : vector<8x128xf32>
    %c0_11 = arith.constant 0 : index
    %c0_12 = arith.constant 0 : index
    %13 = vector.load %arg4[%c0_11, %c0_12] : memref<128x128xf32, #tpu.memory_space<vmem>>, vector<128x128xf32>
    %cst_13 = arith.constant dense<0.000000e+00> : vector<8x128xf32>
    %14 = tpu.matmul %12, %13, %cst_13 {dimension_numbers = #tpu.dot_dimension_numbers<[1], [0], [0], [1], [0, 0, 1, 1], [], []>} : vector<8x128xf32>, vector<128x128xf32>, vector<8x128xf32> -> vector<8x128xf32>
    %c0_14 = arith.constant 0 : index
    %c0_15 = arith.constant 0 : index
    %15 = vector.load %arg6[%c0_14, %c0_15] : memref<1x128xf32, #tpu.memory_space<vmem>>, vector<1x128xf32>
    %16 = vector.broadcast %15 : vector<1x128xf32> to vector<8x128xf32>
    %17 = arith.mulf %14, %16 : vector<8x128xf32>
    %18 = arith.addf %9, %17 : vector<8x128xf32>
    %c0_16 = arith.constant 0 : index
    %c0_17 = arith.constant 0 : index
    %19 = vector.load %arg7[%c0_16, %c0_17] : memref<1x128xf32, #tpu.memory_space<vmem>>, vector<1x128xf32>
    %20 = vector.broadcast %19 : vector<1x128xf32> to vector<8x128xf32>
    %21 = arith.addf %18, %20 : vector<8x128xf32>
    %cst_18 = arith.constant 0.000000e+00 : f32
    %22 = vector.broadcast %cst_18 : f32 to vector<8x128xf32>
    %23 = arith.maximumf %21, %22 : vector<8x128xf32>
    %c0_19 = arith.constant 0 : index
    %c0_20 = arith.constant 0 : index
    %24 = vector.load %arg8[%c0_19, %c0_20] : memref<128x128xf32, #tpu.memory_space<vmem>>, vector<128x128xf32>
    %cst_21 = arith.constant dense<0.000000e+00> : vector<8x128xf32>
    %25 = tpu.matmul %7, %24, %cst_21 {dimension_numbers = #tpu.dot_dimension_numbers<[1], [0], [0], [1], [0, 0, 1, 1], [], []>} : vector<8x128xf32>, vector<128x128xf32>, vector<8x128xf32> -> vector<8x128xf32>
    %c0_22 = arith.constant 0 : index
    %c0_23 = arith.constant 0 : index
    %26 = vector.load %arg10[%c0_22, %c0_23] : memref<1x128xf32, #tpu.memory_space<vmem>>, vector<1x128xf32>
    %27 = vector.broadcast %26 : vector<1x128xf32> to vector<8x128xf32>
    %28 = arith.mulf %7, %27 : vector<8x128xf32>
    %c0_24 = arith.constant 0 : index
    %c0_25 = arith.constant 0 : index
    %29 = vector.load %arg9[%c0_24, %c0_25] : memref<128x128xf32, #tpu.memory_space<vmem>>, vector<128x128xf32>
    %cst_26 = arith.constant dense<0.000000e+00> : vector<8x128xf32>
    %30 = tpu.matmul %28, %29, %cst_26 {dimension_numbers = #tpu.dot_dimension_numbers<[1], [0], [0], [1], [0, 0, 1, 1], [], []>} : vector<8x128xf32>, vector<128x128xf32>, vector<8x128xf32> -> vector<8x128xf32>
    %c0_27 = arith.constant 0 : index
    %c0_28 = arith.constant 0 : index
    %31 = vector.load %arg11[%c0_27, %c0_28] : memref<1x128xf32, #tpu.memory_space<vmem>>, vector<1x128xf32>
    %32 = vector.broadcast %31 : vector<1x128xf32> to vector<8x128xf32>
    %33 = arith.mulf %30, %32 : vector<8x128xf32>
    %34 = arith.addf %25, %33 : vector<8x128xf32>
    %c0_29 = arith.constant 0 : index
    %c0_30 = arith.constant 0 : index
    %35 = vector.load %arg12[%c0_29, %c0_30] : memref<1x128xf32, #tpu.memory_space<vmem>>, vector<1x128xf32>
    %36 = vector.broadcast %35 : vector<1x128xf32> to vector<8x128xf32>
    %37 = arith.addf %34, %36 : vector<8x128xf32>
    %cst_31 = arith.constant 0.000000e+00 : f32
    %38 = vector.broadcast %cst_31 : f32 to vector<8x128xf32>
    %39 = arith.maximumf %37, %38 : vector<8x128xf32>
    %c0_32 = arith.constant 0 : index
    %c0_33 = arith.constant 0 : index
    %40 = vector.load %arg13[%c0_32, %c0_33] : memref<128x512xf32, #tpu.memory_space<vmem>>, vector<128x512xf32>
    %cst_34 = arith.constant dense<0.000000e+00> : vector<8x512xf32>
    %41 = tpu.matmul %23, %40, %cst_34 {dimension_numbers = #tpu.dot_dimension_numbers<[1], [0], [0], [1], [0, 0, 1, 1], [], []>} : vector<8x128xf32>, vector<128x512xf32>, vector<8x512xf32> -> vector<8x512xf32>
    %c0_35 = arith.constant 0 : index
    %c0_36 = arith.constant 0 : index
    %42 = vector.load %arg15[%c0_35, %c0_36] : memref<1x128xf32, #tpu.memory_space<vmem>>, vector<1x128xf32>
    %43 = vector.broadcast %42 : vector<1x128xf32> to vector<8x128xf32>
    %44 = arith.mulf %23, %43 : vector<8x128xf32>
    %c0_37 = arith.constant 0 : index
    %c0_38 = arith.constant 0 : index
    %45 = vector.load %arg14[%c0_37, %c0_38] : memref<128x512xf32, #tpu.memory_space<vmem>>, vector<128x512xf32>
    %cst_39 = arith.constant dense<0.000000e+00> : vector<8x512xf32>
    %46 = tpu.matmul %44, %45, %cst_39 {dimension_numbers = #tpu.dot_dimension_numbers<[1], [0], [0], [1], [0, 0, 1, 1], [], []>} : vector<8x128xf32>, vector<128x512xf32>, vector<8x512xf32> -> vector<8x512xf32>
    %c0_40 = arith.constant 0 : index
    %c0_41 = arith.constant 0 : index
    %47 = vector.load %arg16[%c0_40, %c0_41] : memref<1x512xf32, #tpu.memory_space<vmem>>, vector<1x512xf32>
    %48 = vector.broadcast %47 : vector<1x512xf32> to vector<8x512xf32>
    %49 = arith.mulf %46, %48 : vector<8x512xf32>
    %50 = arith.addf %41, %49 : vector<8x512xf32>
    %c0_42 = arith.constant 0 : index
    %c0_43 = arith.constant 0 : index
    %51 = vector.load %arg17[%c0_42, %c0_43] : memref<1x512xf32, #tpu.memory_space<vmem>>, vector<1x512xf32>
    %52 = vector.broadcast %51 : vector<1x512xf32> to vector<8x512xf32>
    %53 = arith.addf %50, %52 : vector<8x512xf32>
    %c0_44 = arith.constant 0 : index
    %c0_45 = arith.constant 0 : index
    %54 = vector.load %arg18[%c0_44, %c0_45] : memref<128x51xf32, #tpu.memory_space<vmem>>, vector<128x51xf32>
    %cst_46 = arith.constant dense<0.000000e+00> : vector<8x51xf32>
    %55 = tpu.matmul %39, %54, %cst_46 {dimension_numbers = #tpu.dot_dimension_numbers<[1], [0], [0], [1], [0, 0, 1, 1], [], []>} : vector<8x128xf32>, vector<128x51xf32>, vector<8x51xf32> -> vector<8x51xf32>
    %c0_47 = arith.constant 0 : index
    %c0_48 = arith.constant 0 : index
    %56 = vector.load %arg20[%c0_47, %c0_48] : memref<1x128xf32, #tpu.memory_space<vmem>>, vector<1x128xf32>
    %57 = vector.broadcast %56 : vector<1x128xf32> to vector<8x128xf32>
    %58 = arith.mulf %39, %57 : vector<8x128xf32>
    %c0_49 = arith.constant 0 : index
    %c0_50 = arith.constant 0 : index
    %59 = vector.load %arg19[%c0_49, %c0_50] : memref<128x51xf32, #tpu.memory_space<vmem>>, vector<128x51xf32>
    %cst_51 = arith.constant dense<0.000000e+00> : vector<8x51xf32>
    %60 = tpu.matmul %58, %59, %cst_51 {dimension_numbers = #tpu.dot_dimension_numbers<[1], [0], [0], [1], [0, 0, 1, 1], [], []>} : vector<8x128xf32>, vector<128x51xf32>, vector<8x51xf32> -> vector<8x51xf32>
    %c0_52 = arith.constant 0 : index
    %c0_53 = arith.constant 0 : index
    %61 = vector.load %arg21[%c0_52, %c0_53] : memref<1x51xf32, #tpu.memory_space<vmem>>, vector<1x51xf32>
    %62 = vector.broadcast %61 : vector<1x51xf32> to vector<8x51xf32>
    %63 = arith.mulf %60, %62 : vector<8x51xf32>
    %64 = arith.addf %55, %63 : vector<8x51xf32>
    %c0_54 = arith.constant 0 : index
    %c0_55 = arith.constant 0 : index
    %65 = vector.load %arg22[%c0_54, %c0_55] : memref<1x51xf32, #tpu.memory_space<vmem>>, vector<1x51xf32>
    %66 = vector.broadcast %65 : vector<1x51xf32> to vector<8x51xf32>
    %67 = arith.addf %64, %66 : vector<8x51xf32>
    %c0_56 = arith.constant 0 : index
    %c0_57 = arith.constant 0 : index
    %68 = vector.load %arg23[%c0_56, %c0_57] : memref<1x51xf32, #tpu.memory_space<vmem>>, vector<1x51xf32>
    %69 = vector.extract_strided_slice %53 {offsets = [0, 0], sizes = [8, 51], strides = [1, 1]} : vector<8x512xf32> to vector<8x51xf32>
    %70 = vector.extract_strided_slice %53 {offsets = [0, 128], sizes = [8, 51], strides = [1, 1]} : vector<8x512xf32> to vector<8x51xf32>
    %71 = vector.extract_strided_slice %53 {offsets = [0, 256], sizes = [8, 51], strides = [1, 1]} : vector<8x512xf32> to vector<8x51xf32>
    %72 = vector.extract_strided_slice %53 {offsets = [0, 384], sizes = [8, 51], strides = [1, 1]} : vector<8x512xf32> to vector<8x51xf32>
    %73 = arith.addf %69, %70 : vector<8x51xf32>
    %74 = arith.addf %73, %71 : vector<8x51xf32>
    %75 = arith.addf %74, %72 : vector<8x51xf32>
    %cst_58 = arith.constant 2.500000e-01 : f32
    %76 = vector.broadcast %cst_58 : f32 to vector<8x51xf32>
    %77 = arith.mulf %75, %76 : vector<8x51xf32>
    %78 = arith.addf %67, %69 : vector<8x51xf32>
    %79 = arith.subf %78, %77 : vector<8x51xf32>
    %cst_59 = arith.constant dense<0xFF800000> : vector<8xf32>
    %80 = vector.multi_reduction <maximumf>, %79, %cst_59 [1] : vector<8x51xf32> to vector<8xf32>
    %81 = vector.shape_cast %80 : vector<8xf32> to vector<8x1xf32>
    %82 = vector.broadcast %81 : vector<8x1xf32> to vector<8x51xf32>
    %83 = arith.subf %79, %82 : vector<8x51xf32>
    %84 = math.exp %83 : vector<8x51xf32>
    %cst_60 = arith.constant dense<0.000000e+00> : vector<8xf32>
    %85 = vector.multi_reduction <add>, %84, %cst_60 [1] : vector<8x51xf32> to vector<8xf32>
    %86 = vector.shape_cast %85 : vector<8xf32> to vector<8x1xf32>
    %87 = vector.broadcast %86 : vector<8x1xf32> to vector<8x51xf32>
    %88 = arith.divf %84, %87 : vector<8x51xf32>
    %cst_61 = arith.constant 1.000000e-03 : f32
    %89 = vector.broadcast %cst_61 : f32 to vector<8x51xf32>
    %90 = arith.maximumf %88, %89 : vector<8x51xf32>
    %91 = vector.broadcast %68 : vector<1x51xf32> to vector<8x51xf32>
    %92 = arith.mulf %90, %91 : vector<8x51xf32>
    %cst_62 = arith.constant dense<0.000000e+00> : vector<8xf32>
    %93 = vector.multi_reduction <add>, %92, %cst_62 [1] : vector<8x51xf32> to vector<8xf32>
    %94 = vector.shape_cast %93 : vector<8xf32> to vector<8x1xf32>
    %95 = arith.addf %67, %70 : vector<8x51xf32>
    %96 = arith.subf %95, %77 : vector<8x51xf32>
    %cst_63 = arith.constant dense<0xFF800000> : vector<8xf32>
    %97 = vector.multi_reduction <maximumf>, %96, %cst_63 [1] : vector<8x51xf32> to vector<8xf32>
    %98 = vector.shape_cast %97 : vector<8xf32> to vector<8x1xf32>
    %99 = vector.broadcast %98 : vector<8x1xf32> to vector<8x51xf32>
    %100 = arith.subf %96, %99 : vector<8x51xf32>
    %101 = math.exp %100 : vector<8x51xf32>
    %cst_64 = arith.constant dense<0.000000e+00> : vector<8xf32>
    %102 = vector.multi_reduction <add>, %101, %cst_64 [1] : vector<8x51xf32> to vector<8xf32>
    %103 = vector.shape_cast %102 : vector<8xf32> to vector<8x1xf32>
    %104 = vector.broadcast %103 : vector<8x1xf32> to vector<8x51xf32>
    %105 = arith.divf %101, %104 : vector<8x51xf32>
    %cst_65 = arith.constant 1.000000e-03 : f32
    %106 = vector.broadcast %cst_65 : f32 to vector<8x51xf32>
    %107 = arith.maximumf %105, %106 : vector<8x51xf32>
    %108 = vector.broadcast %68 : vector<1x51xf32> to vector<8x51xf32>
    %109 = arith.mulf %107, %108 : vector<8x51xf32>
    %cst_66 = arith.constant dense<0.000000e+00> : vector<8xf32>
    %110 = vector.multi_reduction <add>, %109, %cst_66 [1] : vector<8x51xf32> to vector<8xf32>
    %111 = vector.shape_cast %110 : vector<8xf32> to vector<8x1xf32>
    %112 = arith.addf %67, %71 : vector<8x51xf32>
    %113 = arith.subf %112, %77 : vector<8x51xf32>
    %cst_67 = arith.constant dense<0xFF800000> : vector<8xf32>
    %114 = vector.multi_reduction <maximumf>, %113, %cst_67 [1] : vector<8x51xf32> to vector<8xf32>
    %115 = vector.shape_cast %114 : vector<8xf32> to vector<8x1xf32>
    %116 = vector.broadcast %115 : vector<8x1xf32> to vector<8x51xf32>
    %117 = arith.subf %113, %116 : vector<8x51xf32>
    %118 = math.exp %117 : vector<8x51xf32>
    %cst_68 = arith.constant dense<0.000000e+00> : vector<8xf32>
    %119 = vector.multi_reduction <add>, %118, %cst_68 [1] : vector<8x51xf32> to vector<8xf32>
    %120 = vector.shape_cast %119 : vector<8xf32> to vector<8x1xf32>
    %121 = vector.broadcast %120 : vector<8x1xf32> to vector<8x51xf32>
    %122 = arith.divf %118, %121 : vector<8x51xf32>
    %cst_69 = arith.constant 1.000000e-03 : f32
    %123 = vector.broadcast %cst_69 : f32 to vector<8x51xf32>
    %124 = arith.maximumf %122, %123 : vector<8x51xf32>
    %125 = vector.broadcast %68 : vector<1x51xf32> to vector<8x51xf32>
    %126 = arith.mulf %124, %125 : vector<8x51xf32>
    %cst_70 = arith.constant dense<0.000000e+00> : vector<8xf32>
    %127 = vector.multi_reduction <add>, %126, %cst_70 [1] : vector<8x51xf32> to vector<8xf32>
    %128 = vector.shape_cast %127 : vector<8xf32> to vector<8x1xf32>
    %129 = arith.addf %67, %72 : vector<8x51xf32>
    %130 = arith.subf %129, %77 : vector<8x51xf32>
    %cst_71 = arith.constant dense<0xFF800000> : vector<8xf32>
    %131 = vector.multi_reduction <maximumf>, %130, %cst_71 [1] : vector<8x51xf32> to vector<8xf32>
    %132 = vector.shape_cast %131 : vector<8xf32> to vector<8x1xf32>
    %133 = vector.broadcast %132 : vector<8x1xf32> to vector<8x51xf32>
    %134 = arith.subf %130, %133 : vector<8x51xf32>
    %135 = math.exp %134 : vector<8x51xf32>
    %cst_72 = arith.constant dense<0.000000e+00> : vector<8xf32>
    %136 = vector.multi_reduction <add>, %135, %cst_72 [1] : vector<8x51xf32> to vector<8xf32>
    %137 = vector.shape_cast %136 : vector<8xf32> to vector<8x1xf32>
    %138 = vector.broadcast %137 : vector<8x1xf32> to vector<8x51xf32>
    %139 = arith.divf %135, %138 : vector<8x51xf32>
    %cst_73 = arith.constant 1.000000e-03 : f32
    %140 = vector.broadcast %cst_73 : f32 to vector<8x51xf32>
    %141 = arith.maximumf %139, %140 : vector<8x51xf32>
    %142 = vector.broadcast %68 : vector<1x51xf32> to vector<8x51xf32>
    %143 = arith.mulf %141, %142 : vector<8x51xf32>
    %cst_74 = arith.constant dense<0.000000e+00> : vector<8xf32>
    %144 = vector.multi_reduction <add>, %143, %cst_74 [1] : vector<8x51xf32> to vector<8xf32>
    %145 = vector.shape_cast %144 : vector<8xf32> to vector<8x1xf32>
    %c0_75 = arith.constant 0 : index
    %c0_76 = arith.constant 0 : index
    %146 = vector.load %arg24[%c0_75, %c0_76] : memref<8x4xf32, #tpu.memory_space<vmem>>, vector<8x1xf32>
    tpu.vector_store %arg24[%c0_75, %c0_76], %94 {strides = array<i32>} : memref<8x4xf32, #tpu.memory_space<vmem>>, vector<8x1xf32>,
    %c0_77 = arith.constant 0 : index
    %c1 = arith.constant 1 : index
    %147 = vector.load %arg24[%c0_77, %c1] : memref<8x4xf32, #tpu.memory_space<vmem>>, vector<8x1xf32>
    tpu.vector_store %arg24[%c0_77, %c1], %111 {strides = array<i32>} : memref<8x4xf32, #tpu.memory_space<vmem>>, vector<8x1xf32>,
    %c0_78 = arith.constant 0 : index
    %c2 = arith.constant 2 : index
    %148 = vector.load %arg24[%c0_78, %c2] : memref<8x4xf32, #tpu.memory_space<vmem>>, vector<8x1xf32>
    tpu.vector_store %arg24[%c0_78, %c2], %128 {strides = array<i32>} : memref<8x4xf32, #tpu.memory_space<vmem>>, vector<8x1xf32>,
    %c0_79 = arith.constant 0 : index
    %c3 = arith.constant 3 : index
    %149 = vector.load %arg24[%c0_79, %c3] : memref<8x4xf32, #tpu.memory_space<vmem>>, vector<8x1xf32>
    tpu.vector_store %arg24[%c0_79, %c3], %145 {strides = array<i32>} : memref<8x4xf32, #tpu.memory_space<vmem>>, vector<8x1xf32>,
    return
  }
}

</mosaic_0001>

<bundles_post_ra>
// kernel: network_forward.1
= control target key start
LH: loop header
LB: loop body
LE: loop exit
PB: predicated region body
PF: predicated region fallthrough
CT: control target
= control target key end

     0   :  { %v1949_v0 = vmov 0.0|0.0   ;;  %vm1950_vm0 = vmmov 0   ;;  %v1951_v3 = vmov 0.0   ;;  %vm87_vm1 = vcmask 130048   ;;  %s2905_s1 = inlined_call_operand.vmem [shape: f32[16,128], index: 1, kind: input, shape index: {}]   ;;  %s2906_s3 = inlined_call_operand.vmem [shape: f32[128,128], index: 3, kind: input, shape index: {}]   ;;  %s2907_s4 = inlined_call_operand.vmem [shape: f32[128,128], index: 4, kind: input, shape index: {}]   ;;  %s2908_s0 = inlined_call_operand.vmem [shape: f32[8,16], index: 0, kind: input, shape index: {}]   ;;  %s2909_s2 = inlined_call_operand.vmem [shape: f32[1,128], index: 2, kind: input, shape index: {}]   ;;  %s2910_s8 = inlined_call_operand.vmem [shape: f32[128,128], index: 8, kind: input, shape index: {}]   ;;  %s2911_s9 = inlined_call_operand.vmem [shape: f32[128,128], index: 9, kind: input, shape index: {}]   ;;  %s2912_s5 = inlined_call_operand.vmem [shape: f32[1,128], index: 5, kind: input, shape index: {}]   ;;  %s2913_s14 = inlined_call_operand.vmem [shape: f32[128,512], index: 14, kind: input, shape index: {}]   ;;  %s2914_s10 = inlined_call_operand.vmem [shape: f32[1,128], index: 10, kind: input, shape index: {}]   ;;  %s2915_s13 = inlined_call_operand.vmem [shape: f32[128,512], index: 13, kind: input, shape index: {}]   ;;  %s2916_s6 = inlined_call_operand.vmem [shape: f32[1,128], index: 6, kind: input, shape index: {}]   ;;  %s2917_s7 = inlined_call_operand.vmem [shape: f32[1,128], index: 7, kind: input, shape index: {}]   ;;  %s2918_s15 = inlined_call_operand.vmem [shape: f32[1,128], index: 15, kind: input, shape index: {}]   ;;  %s2919_s11 = inlined_call_operand.vmem [shape: f32[1,128], index: 11, kind: input, shape index: {}]   ;;  %s2920_s19 = inlined_call_operand.vmem [shape: f32[128,51], index: 19, kind: input, shape index: {}]   ;;  %s2921_s18 = inlined_call_operand.vmem [shape: f32[128,51], index: 18, kind: input, shape index: {}]   ;;  %s2922_s12 = inlined_call_operand.vmem [shape: f32[1,128], index: 12, kind: input, shape index: {}]   ;;  %s2923_s20 = inlined_call_operand.vmem [shape: f32[1,128], index: 20, kind: input, shape index: {}]   ;;  %s2924_s16 = inlined_call_operand.vmem [shape: f32[1,512], index: 16, kind: input, shape index: {}]   ;;  %s2925_s17 = inlined_call_operand.vmem [shape: f32[1,512], index: 17, kind: input, shape index: {}]   ;;  %s2926_s21 = inlined_call_operand.vmem [shape: f32[1,51], index: 21, kind: input, shape index: {}]   ;;  %s2927_s22 = inlined_call_operand.vmem [shape: f32[1,51], index: 22, kind: input, shape index: {}]   ;;  %s2928_s23 = inlined_call_operand.vmem [shape: f32[1,51], index: 23, kind: input, shape index: {}]   ;;  %s2929_s24 = inlined_call_operand.vmem [shape: f32[8,4], index: 24, kind: output, shape index: {}]  }
   0x1   :  { %2936 = sst [smem:[#allocation2_spill]] %s2905_s1  ;;  %1655 = vmatprep.subr.bf16.mxu0 %v1949_v0  ;;  %1442 = vmatprep.mubr.msk.f32.mxu0 %vm1950_vm0, %v1951_v3  ;;  %vm1231_vm2 = vcmask 416768   ;;  %vm1308_vm3 = vcmask 7168   ;;  %vm1310_vm4 = vcmask 15368   ;;  %vm1312_vm5 = vcmask 23568  }
   0x2   :  { %2937 = sst [smem:[#allocation3_spill]] %s2906_s3  ;;  %s2945_s27 = sld [smem:[#allocation2_spill]]  ;;  %1658 = vmatprep.subr.bf16.mxu1 %v1949_v0  ;;  %1477 = vmatprep.mubr.msk.f32.mxu1 %vm1950_vm0, %v1951_v3  ;;  %vm1314_vm6 = vcmask 31768  }
   0x3   :  { %2938 = sst [smem:[#allocation4_spill]] %s2907_s4 }
   0x4   :  { %2939 = sst [smem:[#allocation5_spill]] %s2908_s0  ;;  %s2946_s0 = sld [smem:[#allocation3_spill]] }
   0x5   :  { %2940 = sst [smem:[#allocation6_spill]] %s2909_s2 }
   0x6   :  { %2941 = sst [smem:[#allocation7_spill]] %s2910_s8  ;;  %s2949_s1 = sld [smem:[#allocation6_spill]] }
   0x7   :  { %2942 = sst [smem:[#allocation8_spill]] %s2911_s9  ;;  %s2950_s2 = sld [smem:[#allocation7_spill]] }
   0x8   :  { %2943 = sst [smem:[#allocation9_spill]] %s2912_s5  ;;  %v78_v1 = vld [vmem:[%s2945_s27] sm:$0xff]  ;;  %v79_v2 = vld [vmem:[%s2945_s27 + $0x8] sm:$0xff]  ;;  %s2948_s27 = sld [smem:[#allocation5_spill]] }
   0x9   :  { %2944 = sst [smem:[#allocation10_spill]] %s2913_s14  ;;  %v1656_v4 = vpack.c.bf16 %v79_v2, %v78_v1  ;;  %s2947_s14 = sld [smem:[#allocation4_spill]] }
   0xa   :  { %v162_v5 = vld [vmem:[%s2946_s0] sm:$0xff]  ;;  %v163_v6 = vld [vmem:[%s2946_s0 + $0x8] sm:$0xff]  ;;  %v164_v14 = vld [vmem:[%s2946_s0 + $0x10] sm:$0xff]  ;;  %s2952_s5 = sld [smem:[#allocation9_spill]] }
   0xb   :  { %1657 = vmatpush3.bf16.msra.mxu0 %v1656_v4  ;;  %v1683_v10 = vpack.c.bf16 %v163_v6, %v162_v5  ;;  %v165_v15 = vld [vmem:[%s2946_s0 + $0x18] sm:$0xff]  ;;  %v166_v20 = vld [vmem:[%s2946_s0 + $0x20] sm:$0xff]  ;;  %v167_v21 = vld [vmem:[%s2946_s0 + $0x28] sm:$0xff] }
   0xc   :  { %1682 = vmatprep.subr.bf16.mxu0 %v1949_v0  ;;  %v1686_v19 = vpack.c.bf16 %v165_v15, %v164_v14  ;;  %v1689_v25 = vpack.c.bf16 %v167_v21, %v166_v20  ;;  %v168_v26 = vld [vmem:[%s2946_s0 + $0x30] sm:$0xff]  ;;  %v169_v27 = vld [vmem:[%s2946_s0 + $0x38] sm:$0xff]  ;;  %v170_v32 = vld [vmem:[%s2946_s0 + $0x40] sm:$0xff] }
   0xd   :  { %v1692_v31 = vpack.c.bf16 %v169_v27, %v168_v26  ;;  %v171_v33 = vld [vmem:[%s2946_s0 + $0x48] sm:$0xff]  ;;  %v172_v38 = vld [vmem:[%s2946_s0 + $0x50] sm:$0xff]  ;;  %v173_v39 = vld [vmem:[%s2946_s0 + $0x58] sm:$0xff] }
   0xe   :  { %v77_v9 = vld [vmem:[%s2948_s27] sm:$0xff]  ;;  %v1695_v37 = vpack.c.bf16 %v171_v33, %v170_v32  ;;  %v1698_v43 = vpack.c.bf16 %v173_v39, %v172_v38  ;;  %v175_v45 = vld [vmem:[%s2946_s0 + $0x68] sm:$0xff]  ;;  %v176_v48 = vld [vmem:[%s2946_s0 + $0x70] sm:$0xff]  ;;  %s2951_s27 = sld [smem:[#allocation8_spill]] }
   0xf   :  { %v186_v7 = vld [vmem:[%s2947_s14] sm:$0xff]  ;;  %v187_v8 = vld [vmem:[%s2947_s14 + $0x8] sm:$0xff]  ;;  %v188_v12 = vld [vmem:[%s2947_s14 + $0x10] sm:$0xff]  ;;  %1443 = vmatmul.mubr.msk.f32.vlgmr.msra.gmra.mrb[0].mxu0 %vm87_vm1, %v77_v9 }
  0x10   :  { %v1659_v11 = vpack.c.bf16 %v187_v8, %v186_v7  ;;  %v189_v13 = vld [vmem:[%s2947_s14 + $0x18] sm:$0xff]  ;;  %v190_v17 = vld [vmem:[%s2947_s14 + $0x20] sm:$0xff]  ;;  %v191_v18 = vld [vmem:[%s2947_s14 + $0x28] sm:$0xff]  ;;  %1684 = vmatpush3.bf16.msra.mxu0 %v1683_v10  ;;  %1512 = vmatprep.mubr.msk.f32.mxu0 %vm1950_vm0, %v1951_v3 }
  0x11   :  { %v1662_v16 = vpack.c.bf16 %v189_v13, %v188_v12  ;;  %1685 = vmatprep.subr.bf16.mxu0 %v1949_v0  ;;  %v1665_v22 = vpack.c.bf16 %v191_v18, %v190_v17  ;;  %v192_v23 = vld [vmem:[%s2947_s14 + $0x30] sm:$0xff]  ;;  %v193_v24 = vld [vmem:[%s2947_s14 + $0x38] sm:$0xff]  ;;  %v194_v29 = vld [vmem:[%s2947_s14 + $0x40] sm:$0xff] }
  0x12   :  { %1660 = vmatpush3.bf16.msra.mxu1 %v1659_v11  ;;  %v1668_v28 = vpack.c.bf16 %v193_v24, %v192_v23  ;;  %v195_v30 = vld [vmem:[%s2947_s14 + $0x48] sm:$0xff]  ;;  %v196_v35 = vld [vmem:[%s2947_s14 + $0x50] sm:$0xff]  ;;  %v197_v36 = vld [vmem:[%s2947_s14 + $0x58] sm:$0xff] }
  0x13   :  { %1661 = vmatprep.subr.bf16.mxu1 %v1949_v0  ;;  %v1671_v34 = vpack.c.bf16 %v195_v30, %v194_v29  ;;  %v1674_v40 = vpack.c.bf16 %v197_v36, %v196_v35  ;;  %v198_v41 = vld [vmem:[%s2947_s14 + $0x60] sm:$0xff]  ;;  %v199_v42 = vld [vmem:[%s2947_s14 + $0x68] sm:$0xff]  ;;  %v177_v49 = vld [vmem:[%s2946_s0 + $0x78] sm:$0xff] }
  0x14   :  { %1687 = vmatpush3.bf16.msra.mxu0 %v1686_v19  ;;  %v174_v44 = vld [vmem:[%s2946_s0 + $0x60] sm:$0xff]  ;;  %v1677_v46 = vpack.c.bf16 %v199_v42, %v198_v41  ;;  %v1704_v50 = vpack.c.bf16 %v177_v49, %v176_v48  ;;  %v200_v51 = vld [vmem:[%s2947_s14 + $0x70] sm:$0xff]  ;;  %v201_v52 = vld [vmem:[%s2947_s14 + $0x78] sm:$0xff]  ;;  %s2953_s0 = sld [smem:[#allocation10_spill]] }
  0x15   :  { %1688 = vmatprep.subr.bf16.mxu0 %v1949_v0  ;;  %v1701_v47 = vpack.c.bf16 %v175_v45, %v174_v44  ;;  %v1680_v53 = vpack.c.bf16 %v201_v52, %v200_v51  ;;  %v1320_v54 = vld [vmem:[%s2949_s1] ss:$0 sm:$0xff]  ;;  %v360_v56 = vld [vmem:[%s2950_s2 + $0x8] sm:$0xff]  ;;  %v361_v2 = vld [vmem:[%s2950_s2 + $0x10] sm:$0xff] }
  0x16   :  { %1663 = vmatpush3.bf16.msra.mxu1 %v1662_v16  ;;  %v359_v55 = vld [vmem:[%s2950_s2] sm:$0xff]  ;;  %v384_v61 = vld [vmem:[%s2951_s27 + $0x8] sm:$0xff]  ;;  %v362_v4 = vld [vmem:[%s2950_s2 + $0x18] sm:$0xff] }
  0x17   :  { %1664 = vmatprep.subr.bf16.mxu1 %v1949_v0  ;;  %v383_v60 = vld [vmem:[%s2951_s27] sm:$0xff]  ;;  %v1731_v62 = vpack.c.bf16 %v360_v56, %v359_v55  ;;  %v385_v7 = vld [vmem:[%s2951_s27 + $0x10] sm:$0xff]  ;;  %v386_v8 = vld [vmem:[%s2951_s27 + $0x18] sm:$0xff]  ;;  %v1734_v9 = vpack.c.bf16 %v362_v4, %v361_v2 }
  0x18   :  { %1690 = vmatpush3.bf16.msra.mxu0 %v1689_v25  ;;  %v1322_v63 = vld [vmem:[%s2952_s5] ss:$0 sm:$0xff]  ;;  %v1707_v5 = vpack.c.bf16 %v384_v61, %v383_v60  ;;  %v364_v11 = vld [vmem:[%s2950_s2 + $0x28] sm:$0xff]  ;;  %v1710_v12 = vpack.c.bf16 %v386_v8, %v385_v7  ;;  %v365_v16 = vld [vmem:[%s2950_s2 + $0x30] sm:$0xff] }
  0x19   :  { %1691 = vmatprep.subr.bf16.mxu0 %v1949_v0  ;;  %v363_v10 = vld [vmem:[%s2950_s2 + $0x20] sm:$0xff]  ;;  %v388_v14 = vld [vmem:[%s2951_s27 + $0x28] sm:$0xff]  ;;  %v366_v17 = vld [vmem:[%s2950_s2 + $0x38] sm:$0xff] }
  0x1a   :  { %1666 = vmatpush3.bf16.msra.mxu1 %v1665_v22  ;;  %v387_v13 = vld [vmem:[%s2951_s27 + $0x20] sm:$0xff]  ;;  %v1737_v15 = vpack.c.bf16 %v364_v11, %v363_v10  ;;  %v389_v19 = vld [vmem:[%s2951_s27 + $0x30] sm:$0xff]  ;;  %v390_v20 = vld [vmem:[%s2951_s27 + $0x38] sm:$0xff]  ;;  %v1740_v21 = vpack.c.bf16 %v366_v17, %v365_v16 }
  0x1b   :  { %1667 = vmatprep.subr.bf16.mxu1 %v1949_v0  ;;  %v1713_v18 = vpack.c.bf16 %v388_v14, %v387_v13  ;;  %v367_v22 = vld [vmem:[%s2950_s2 + $0x40] sm:$0xff]  ;;  %v368_v23 = vld [vmem:[%s2950_s2 + $0x48] sm:$0xff]  ;;  %v1716_v24 = vpack.c.bf16 %v390_v20, %v389_v19  ;;  %v370_v29 = vld [vmem:[%s2950_s2 + $0x58] sm:$0xff] }
  0x1c   :  { %1693 = vmatpush3.bf16.msra.mxu0 %v1692_v31  ;;  %v391_v25 = vld [vmem:[%s2951_s27 + $0x40] sm:$0xff]  ;;  %v392_v26 = vld [vmem:[%s2951_s27 + $0x48] sm:$0xff]  ;;  %v1743_v27 = vpack.c.bf16 %v368_v23, %v367_v22  ;;  %v393_v31 = vld [vmem:[%s2951_s27 + $0x50] sm:$0xff] }
  0x1d   :  { %1694 = vmatprep.subr.bf16.mxu0 %v1949_v0  ;;  %v1719_v30 = vpack.c.bf16 %v392_v26, %v391_v25  ;;  %v394_v32 = vld [vmem:[%s2951_s27 + $0x58] sm:$0xff]  ;;  %v372_v35 = vld [vmem:[%s2950_s2 + $0x68] sm:$0xff]  ;;  %v397_v45 = vld [vmem:[%s2951_s27 + $0x70] sm:$0xff] }
  0x1e   :  { %1669 = vmatpush3.bf16.msra.mxu1 %v1668_v28  ;;  %v369_v28 = vld [vmem:[%s2950_s2 + $0x50] sm:$0xff]  ;;  %v1722_v36 = vpack.c.bf16 %v394_v32, %v393_v31  ;;  %v396_v38 = vld [vmem:[%s2951_s27 + $0x68] sm:$0xff]  ;;  %v374_v41 = vld [vmem:[%s2950_s2 + $0x78] sm:$0xff] }
  0x1f   :  { %1670 = vmatprep.subr.bf16.mxu1 %v1949_v0  ;;  %v1746_v33 = vpack.c.bf16 %v370_v29, %v369_v28  ;;  %v635_v44 = vld [vmem:[%s2953_s0 + $0x38] sm:$0xff]  ;;  %v629_v48 = vld [vmem:[%s2953_s0 + $0x8] sm:$0xff]  ;;  %v630_v51 = vld [vmem:[%s2953_s0 + $0x10] sm:$0xff] }
  0x20   :  { %1696 = vmatpush3.bf16.msra.mxu0 %v1695_v37  ;;  %v395_v37 = vld [vmem:[%s2951_s27 + $0x60] sm:$0xff]  ;;  %v633_v49 = vld [vmem:[%s2953_s0 + $0x28] sm:$0xff]  ;;  %v634_v52 = vld [vmem:[%s2953_s0 + $0x30] sm:$0xff] }
  0x21   :  { %1697 = vmatprep.subr.bf16.mxu0 %v1949_v0  ;;  %v1725_v42 = vpack.c.bf16 %v396_v38, %v395_v37  ;;  %v643_v55 = vld [vmem:[%s2953_s0 + $0x78] sm:$0xff]  ;;  %v1754_v56 = vpack.c.bf16 %v633_v49, %v629_v48  ;;  %v1788_v60 = vpack.c.bf16 %v634_v52, %v630_v51  ;;  %v637_v61 = vld [vmem:[%s2953_s0 + $0x48] sm:$0xff]  ;;  %v638_v2 = vld [vmem:[%s2953_s0 + $0x50] sm:$0xff] }
  0x22   :  { %1672 = vmatpush3.bf16.msra.mxu1 %v1671_v34  ;;  %v371_v34 = vld [vmem:[%s2950_s2 + $0x60] sm:$0xff]  ;;  %v642_v4 = vld [vmem:[%s2953_s0 + $0x70] sm:$0xff]  ;;  %v651_v7 = vld [vmem:[%s2953_s0 + $0xb8] sm:$0xff] }
  0x23   :  { %1673 = vmatprep.subr.bf16.mxu1 %v1949_v0  ;;  %v1749_v39 = vpack.c.bf16 %v372_v35, %v371_v34  ;;  %v636_v10 = vld [vmem:[%s2953_s0 + $0x40] sm:$0xff]  ;;  %v645_v13 = vld [vmem:[%s2953_s0 + $0x88] sm:$0xff]  ;;  %v650_v16 = vld [vmem:[%s2953_s0 + $0xb0] sm:$0xff] }
  0x24   :  { %1699 = vmatpush3.bf16.msra.mxu0 %v1698_v43  ;;  %v631_v43 = vld [vmem:[%s2953_s0 + $0x18] sm:$0xff]  ;;  %v640_v11 = vld [vmem:[%s2953_s0 + $0x60] sm:$0xff]  ;;  %v657_v25 = vld [vmem:[%s2953_s0 + $0xe8] sm:$0xff] }
  0x25   :  { %1700 = vmatprep.subr.bf16.mxu0 %v1949_v0  ;;  %v1760_v17 = vpack.c.bf16 %v640_v11, %v636_v10  ;;  %v659_v19 = vld [vmem:[%s2953_s0 + $0xf8] sm:$0xff]  ;;  %v648_v22 = vld [vmem:[%s2953_s0 + $0xa0] sm:$0xff]  ;;  %v658_v28 = vld [vmem:[%s2953_s0 + $0xf0] sm:$0xff] }
  0x26   :  { %1675 = vmatpush3.bf16.msra.mxu1 %v1674_v40  ;;  %v373_v40 = vld [vmem:[%s2950_s2 + $0x70] sm:$0xff]  ;;  %v667_v31 = vld [vmem:[%s2953_s0 + $0x138] sm:$0xff]  ;;  %v656_v34 = vld [vmem:[%s2953_s0 + $0xe0] sm:$0xff] }
  0x27   :  { %1676 = vmatprep.subr.bf16.mxu1 %v1949_v0  ;;  %v665_v37 = vld [vmem:[%s2953_s0 + $0x128] sm:$0xff]  ;;  %v671_v49 = vld [vmem:[%s2953_s0 + $0x158] sm:$0xff]  ;;  %v668_v52 = vld [vmem:[%s2953_s0 + $0x140] sm:$0xff] }
  0x28   :  { %1702 = vmatpush3.bf16.msra.mxu0 %v1701_v47  ;;  %v1752_v47 = vpack.c.bf16 %v374_v41, %v373_v40  ;;  %v666_v40 = vld [vmem:[%s2953_s0 + $0x130] sm:$0xff]  ;;  %v673_v48 = vld [vmem:[%s2953_s0 + $0x168] sm:$0xff]  ;;  %v675_v51 = vld [vmem:[%s2953_s0 + $0x178] sm:$0xff] }
  0x29   :  { %1703 = vmatprep.subr.bf16.mxu0 %v1949_v0  ;;  %v685_v10 = vld [vmem:[%s2953_s0 + $0x1c8] sm:$0xff] }
  0x2a   :  { %1678 = vmatpush3.bf16.msra.mxu1 %v1677_v46  ;;  %v398_v46 = vld [vmem:[%s2951_s27 + $0x78] sm:$0xff]  ;;  %v689_v11 = vld [vmem:[%s2953_s0 + $0x1e8] sm:$0xff] }
  0x2b   :  { %1679 = vmatprep.subr.bf16.mxu1 %v1949_v0 }
  0x2c   :  { %1705 = vmatpush3.bf16.msra.mxu0 %v1704_v50  ;;  %v1786_v50 = vpack.c.bf16 %v635_v44, %v631_v43  ;;  %v660_v43 = vld [vmem:[%s2953_s0 + $0x100] sm:$0xff] }
  0x2d   :  { %1730 = vmatprep.subr.bf16.mxu0 %v1949_v0  ;;  %v664_v44 = vld [vmem:[%s2953_s0 + $0x120] sm:$0xff] }
  0x2e   :  { %1681 = vmatpush3.bf16.msra.mxu1 %v1680_v53  ;;  %v1728_v53 = vpack.c.bf16 %v398_v46, %v397_v45  ;;  %v1772_v46 = vpack.c.bf16 %v664_v44, %v660_v43  ;;  %v567_v43 = vld [vmem:[%s2915_s13 + $0x58] sm:$0xff] }
  0x2f   :  { %1706 = vmatprep.subr.bf16.mxu1 %v1949_v0  ;;  %v571_v44 = vld [vmem:[%s2915_s13 + $0x78] sm:$0xff] }
  0xe2   :  { %v157_v57 = vpop.f32.mrb[0].mxu0 }
  0xe3   :  { %v158_v58 = vadd.f32 %v1320_v54, %v157_v57  ;;  %v1444_v59 = vpop.f32.mrb[1].mxu0  ;;  %v639_v54 = vld [vmem:[%s2953_s0 + $0x58] sm:$0xff]  ;;  %v628_v57 = vld [vmem:[%s2953_s0] sm:$0xff] }
  0xe4   :  { %v1325_v59 = vld [vmem:[%s2914_s10] ss:$0 sm:$0xff] }
  0xe5   :  { %v2225_v1 = vmax.f32 %v158_v58, 0.0  ;;  %v632_v58 = vld [vmem:[%s2953_s0 + $0x20] sm:$0xff] }
  0xe7   :  { %1513 = vmatmul.mubr.f32.vlgmr.msra.gmra.mrb[2].mxu0 %v2225_v1  ;;  %v185_v6 = vmul.f32 %v1322_v63, %v2225_v1  ;;  %v1790_v63 = vpack.c.bf16 %v643_v55, %v639_v54  ;;  %v382_v8 = vmul.f32 %v1325_v59, %v2225_v1  ;;  %v1806_v54 = vpack.c.bf16 %v675_v51, %v671_v49  ;;  %v677_v59 = vld [vmem:[%s2953_s0 + $0x188] sm:$0xff]  ;;  %v568_v49 = vld [vmem:[%s2915_s13 + $0x60] sm:$0xff] }
  0xe8   :  { %1732 = vmatpush3.bf16.msra.mxu0 %v1731_v62  ;;  %1582 = vmatprep.mubr.msk.f32.mxu0 %vm1950_vm0, %v1951_v3  ;;  %v641_v62 = vld [vmem:[%s2953_s0 + $0x68] sm:$0xff] }
  0xe9   :  { %1478 = vmatmul.mubr.f32.vlgmr.msra.gmra.mrb[0].mxu1 %v185_v6  ;;  %1733 = vmatprep.subr.bf16.mxu0 %v1949_v0  ;;  %v647_v6 = vld [vmem:[%s2953_s0 + $0x98] sm:$0xff] }
  0xea   :  { %1708 = vmatpush3.bf16.msra.mxu1 %v1707_v5  ;;  %1547 = vmatprep.mubr.msk.f32.mxu1 %vm1950_vm0, %v1951_v3  ;;  %v1756_v5 = vpack.c.bf16 %v632_v58, %v628_v57  ;;  %v1794_v14 = vpack.c.bf16 %v651_v7, %v647_v6  ;;  %v674_v57 = vld [vmem:[%s2953_s0 + $0x170] sm:$0xff] }
  0xeb   :  { %1709 = vmatprep.subr.bf16.mxu1 %v1949_v0  ;;  %v678_v6 = vld [vmem:[%s2953_s0 + $0x190] sm:$0xff] }
  0xec   :  { %1735 = vmatpush3.bf16.msra.mxu0 %v1734_v9  ;;  %v1758_v9 = vpack.c.bf16 %v641_v62, %v637_v61  ;;  %v679_v62 = vld [vmem:[%s2953_s0 + $0x198] sm:$0xff]  ;;  %v682_v7 = vld [vmem:[%s2953_s0 + $0x1b0] sm:$0xff] }
  0xed   :  { %1736 = vmatprep.subr.bf16.mxu0 %v1949_v0 }
  0xee   :  { %1711 = vmatpush3.bf16.msra.mxu1 %v1710_v12  ;;  %v1792_v12 = vpack.c.bf16 %v642_v4, %v638_v2  ;;  %v676_v2 = vld [vmem:[%s2953_s0 + $0x180] sm:$0xff] }
  0xef   :  { %1712 = vmatprep.subr.bf16.mxu1 %v1949_v0 }
  0xf0   :  { %1738 = vmatpush3.bf16.msra.mxu0 %v1737_v15  ;;  %v646_v15 = vld [vmem:[%s2953_s0 + $0x90] sm:$0xff] }
  0xf1   :  { %1739 = vmatprep.subr.bf16.mxu0 %v1949_v0  ;;  %v1796_v23 = vpack.c.bf16 %v650_v16, %v646_v15  ;;  %v688_v15 = vld [vmem:[%s2953_s0 + $0x1e0] sm:$0xff] }
  0xf2   :  { %1714 = vmatpush3.bf16.msra.mxu1 %v1713_v18  ;;  %v655_v18 = vld [vmem:[%s2953_s0 + $0xd8] sm:$0xff] }
  0xf3   :  { %1715 = vmatprep.subr.bf16.mxu1 %v1949_v0  ;;  %v1798_v26 = vpack.c.bf16 %v659_v19, %v655_v18  ;;  %v686_v18 = vld [vmem:[%s2953_s0 + $0x1d0] sm:$0xff] }
  0xf4   :  { %1741 = vmatpush3.bf16.msra.mxu0 %v1740_v21  ;;  %v644_v21 = vld [vmem:[%s2953_s0 + $0x80] sm:$0xff]  ;;  %v690_v19 = vld [vmem:[%s2953_s0 + $0x1f0] sm:$0xff] }
  0xf5   :  { %1742 = vmatprep.subr.bf16.mxu0 %v1949_v0  ;;  %v1764_v29 = vpack.c.bf16 %v648_v22, %v644_v21  ;;  %v557_v21 = vld [vmem:[%s2915_s13 + $0x8] sm:$0xff] }
  0xf6   :  { %1717 = vmatpush3.bf16.msra.mxu1 %v1716_v24  ;;  %v653_v24 = vld [vmem:[%s2953_s0 + $0xc8] sm:$0xff] }
  0xf7   :  { %1718 = vmatprep.subr.bf16.mxu1 %v1949_v0  ;;  %v1766_v32 = vpack.c.bf16 %v657_v25, %v653_v24  ;;  %v561_v22 = vld [vmem:[%s2915_s13 + $0x28] sm:$0xff]  ;;  %v563_v25 = vld [vmem:[%s2915_s13 + $0x38] sm:$0xff] }
  0xf8   :  { %1744 = vmatpush3.bf16.msra.mxu0 %v1743_v27  ;;  %v654_v27 = vld [vmem:[%s2953_s0 + $0xd0] sm:$0xff]  ;;  %v1818_v24 = vpack.c.bf16 %v561_v22, %v557_v21 }
  0xf9   :  { %1745 = vmatprep.subr.bf16.mxu0 %v1949_v0  ;;  %v1800_v35 = vpack.c.bf16 %v658_v28, %v654_v27  ;;  %v1323_v28 = vld [vmem:[%s2916_s6] ss:$0 sm:$0xff] }
  0xfa   :  { %1720 = vmatpush3.bf16.msra.mxu1 %v1719_v30  ;;  %v663_v30 = vld [vmem:[%s2953_s0 + $0x118] sm:$0xff] }
  0xfb   :  { %1721 = vmatprep.subr.bf16.mxu1 %v1949_v0  ;;  %v1802_v38 = vpack.c.bf16 %v667_v31, %v663_v30 }
  0xfc   :  { %1747 = vmatpush3.bf16.msra.mxu0 %v1746_v33  ;;  %v652_v33 = vld [vmem:[%s2953_s0 + $0xc0] sm:$0xff] }
  0xfd   :  { %1748 = vmatprep.subr.bf16.mxu0 %v1949_v0  ;;  %v1768_v41 = vpack.c.bf16 %v656_v34, %v652_v33  ;;  %v1324_v33 = vld [vmem:[%s2917_s7] ss:$0 sm:$0xff] }
  0xfe   :  { %1723 = vmatpush3.bf16.msra.mxu1 %v1722_v36  ;;  %v661_v36 = vld [vmem:[%s2953_s0 + $0x108] sm:$0xff] }
  0xff   :  { %1724 = vmatprep.subr.bf16.mxu1 %v1949_v0 }
 0x100   :  { %1750 = vmatpush3.bf16.msra.mxu0 %v1749_v39  ;;  %v662_v39 = vld [vmem:[%s2953_s0 + $0x110] sm:$0xff] }
 0x101   :  { %1751 = vmatprep.subr.bf16.mxu0 %v1949_v0  ;;  %v1804_v45 = vpack.c.bf16 %v666_v40, %v662_v39  ;;  %v558_v39 = vld [vmem:[%s2915_s13 + $0x10] sm:$0xff] }
 0x102   :  { %1726 = vmatpush3.bf16.msra.mxu1 %v1725_v42  ;;  %v1770_v42 = vpack.c.bf16 %v665_v37, %v661_v36  ;;  %v556_v36 = vld [vmem:[%s2915_s13] sm:$0xff]  ;;  %v562_v40 = vld [vmem:[%s2915_s13 + $0x30] sm:$0xff] }
 0x103   :  { %1727 = vmatprep.subr.bf16.mxu1 %v1949_v0  ;;  %v560_v37 = vld [vmem:[%s2915_s13 + $0x20] sm:$0xff] }
 0x104   :  { %1753 = vmatpush3.bf16.msra.mxu0 %v1752_v47  ;;  %v669_v47 = vld [vmem:[%s2953_s0 + $0x148] sm:$0xff] }
 0x105   :  { %1787 = vmatprep.subr.bf16.mxu0 %v1786_v50  ;;  %v1774_v50 = vpack.c.bf16 %v673_v48, %v669_v47  ;;  %v1852_v47 = vpack.c.bf16 %v562_v40, %v558_v39  ;;  %v564_v48 = vld [vmem:[%s2915_s13 + $0x40] sm:$0xff]  ;;  %v598_v39 = vld [vmem:[%s2915_s13 + $0x150] sm:$0xff] }
 0x106   :  { %1729 = vmatpush3.bf16.msra.mxu1 %v1728_v53  ;;  %v672_v53 = vld [vmem:[%s2953_s0 + $0x160] sm:$0xff]  ;;  %v602_v40 = vld [vmem:[%s2915_s13 + $0x170] sm:$0xff] }
 0x107   :  { %1583 = vmatmul.mubr.f32.vlgmr.msra.gmra.mrb[4].mxu0 %v2225_v1  ;;  %1755 = vmatprep.subr.bf16.mxu1 %v1754_v56  ;;  %v649_v1 = vld [vmem:[%s2953_s0 + $0xa8] sm:$0xff]  ;;  %v1776_v55 = vpack.c.bf16 %v672_v53, %v668_v52  ;;  %v670_v56 = vld [vmem:[%s2953_s0 + $0x150] sm:$0xff]  ;;  %v1854_v52 = vpack.c.bf16 %v571_v44, %v567_v43  ;;  %v607_v43 = vld [vmem:[%s2915_s13 + $0x198] sm:$0xff] }
 0x108   :  { %1789 = vmatpush1.bf16.msra.mxu0 %v1788_v60  ;;  %827 = vmatprep.mubr.f32.mxu0 %v1951_v3  ;;  %v1762_v20 = vpack.c.bf16 %v649_v1, %v645_v13  ;;  %v1808_v58 = vpack.c.bf16 %v674_v57, %v670_v56  ;;  %v681_v60 = vld [vmem:[%s2953_s0 + $0x1a8] sm:$0xff]  ;;  %v1782_v13 = vpack.c.bf16 %v689_v11, %v685_v10  ;;  %v691_v1 = vld [vmem:[%s2953_s0 + $0x1f8] sm:$0xff]  ;;  %v566_v53 = vld [vmem:[%s2915_s13 + $0x50] sm:$0xff] }
 0x109   :  { %1548 = vmatmul.mubr.f32.vlgmr.msra.gmra.mrb[2].mxu1 %v382_v8  ;;  %1791 = vmatprep.subr.bf16.mxu0 %v1790_v63  ;;  %v1778_v61 = vpack.c.bf16 %v681_v60, %v677_v59  ;;  %v683_v63 = vld [vmem:[%s2953_s0 + $0x1b8] sm:$0xff]  ;;  %v577_v56 = vld [vmem:[%s2915_s13 + $0xa8] sm:$0xff]  ;;  %v1824_v59 = vpack.c.bf16 %v568_v49, %v564_v48  ;;  %v1872_v48 = vpack.c.bf16 %v602_v40, %v598_v39  ;;  %v604_v49 = vld [vmem:[%s2915_s13 + $0x180] sm:$0xff] }
 0x10a   :  { %1757 = vmatpush1.bf16.msra.mxu1 %v1756_v5  ;;  %756 = vmatprep.mubr.f32.mxu1 %v1951_v3  ;;  %v1810_v4 = vpack.c.bf16 %v683_v63, %v679_v62  ;;  %v680_v5 = vld [vmem:[%s2953_s0 + $0x1a0] sm:$0xff]  ;;  %v575_v57 = vld [vmem:[%s2915_s13 + $0x98] sm:$0xff] }
 0x10b   :  { %1759 = vmatprep.subr.bf16.mxu1 %v1758_v9  ;;  %v1780_v8 = vpack.c.bf16 %v680_v5, %v676_v2  ;;  %v1812_v9 = vpack.c.bf16 %v682_v7, %v678_v6  ;;  %v576_v62 = vld [vmem:[%s2915_s13 + $0xa0] sm:$0xff]  ;;  %v578_v5 = vld [vmem:[%s2915_s13 + $0xb0] sm:$0xff]  ;;  %v581_v6 = vld [vmem:[%s2915_s13 + $0xc8] sm:$0xff] }
 0x10c   :  { %1793 = vmatpush1.bf16.msra.mxu0 %v1792_v12  ;;  %v687_v12 = vld [vmem:[%s2953_s0 + $0x1d8] sm:$0xff]  ;;  %v585_v7 = vld [vmem:[%s2915_s13 + $0xe8] sm:$0xff] }
 0x10d   :  { %1795 = vmatprep.subr.bf16.mxu0 %v1794_v14  ;;  %v684_v14 = vld [vmem:[%s2953_s0 + $0x1c0] sm:$0xff]  ;;  %v1814_v16 = vpack.c.bf16 %v691_v1, %v687_v12  ;;  %v1830_v1 = vpack.c.bf16 %v585_v7, %v581_v6  ;;  %v611_v44 = vld [vmem:[%s2915_s13 + $0x1b8] sm:$0xff] }
 0x10e   :  { %1761 = vmatpush1.bf16.msra.mxu1 %v1760_v17  ;;  %v1784_v17 = vpack.c.bf16 %v688_v15, %v684_v14  ;;  %v580_v12 = vld [vmem:[%s2915_s13 + $0xc0] sm:$0xff]  ;;  %v582_v15 = vld [vmem:[%s2915_s13 + $0xd0] sm:$0xff] }
 0x10f   :  { %1763 = vmatprep.subr.bf16.mxu1 %v1762_v20  ;;  %v1816_v20 = vpack.c.bf16 %v690_v19, %v686_v18  ;;  %v593_v18 = vld [vmem:[%s2915_s13 + $0x128] sm:$0xff]  ;;  %v591_v19 = vld [vmem:[%s2915_s13 + $0x118] sm:$0xff] }
 0x110   :  { %1797 = vmatpush1.bf16.msra.mxu0 %v1796_v23  ;;  %v559_v23 = vld [vmem:[%s2915_s13 + $0x18] sm:$0xff] }
 0x111   :  { %1799 = vmatprep.subr.bf16.mxu0 %v1798_v26  ;;  %v1850_v26 = vpack.c.bf16 %v563_v25, %v559_v23  ;;  %v588_v23 = vld [vmem:[%s2915_s13 + $0x100] sm:$0xff] }
 0x112   :  { %1765 = vmatpush1.bf16.msra.mxu1 %v1764_v29 }
 0x113   :  { %1767 = vmatprep.subr.bf16.mxu1 %v1766_v32 }
 0x114   :  { %1801 = vmatpush1.bf16.msra.mxu0 %v1800_v35  ;;  %v1328_v35 = vld [vmem:[%s2918_s15] ss:$0 sm:$0xff] }
 0x115   :  { %1803 = vmatprep.subr.bf16.mxu0 %v1802_v38 }
 0x116   :  { %1769 = vmatpush1.bf16.msra.mxu1 %v1768_v41  ;;  %v565_v41 = vld [vmem:[%s2915_s13 + $0x48] sm:$0xff] }
 0x117   :  { %1771 = vmatprep.subr.bf16.mxu1 %v1770_v42  ;;  %v569_v42 = vld [vmem:[%s2915_s13 + $0x68] sm:$0xff] }
 0x118   :  { %1805 = vmatpush1.bf16.msra.mxu0 %v1804_v45  ;;  %v1822_v51 = vpack.c.bf16 %v569_v42, %v565_v41  ;;  %v605_v41 = vld [vmem:[%s2915_s13 + $0x188] sm:$0xff] }
 0x119   :  { %1807 = vmatprep.subr.bf16.mxu0 %v1806_v54  ;;  %v570_v54 = vld [vmem:[%s2915_s13 + $0x70] sm:$0xff]  ;;  %v609_v42 = vld [vmem:[%s2915_s13 + $0x1a8] sm:$0xff] }
 0x11a   :  { %1773 = vmatpush1.bf16.msra.mxu1 %v1772_v46  ;;  %v1820_v46 = vpack.c.bf16 %v560_v37, %v556_v36  ;;  %v1856_v60 = vpack.c.bf16 %v570_v54, %v566_v53  ;;  %v600_v36 = vld [vmem:[%s2915_s13 + $0x160] sm:$0xff]  ;;  %v606_v53 = vld [vmem:[%s2915_s13 + $0x190] sm:$0xff] }
 0x11b   :  { %1775 = vmatprep.subr.bf16.mxu1 %v1774_v50  ;;  %v610_v54 = vld [vmem:[%s2915_s13 + $0x1b0] sm:$0xff] }
 0x11c   :  { %1809 = vmatpush1.bf16.msra.mxu0 %v1808_v58  ;;  %v579_v58 = vld [vmem:[%s2915_s13 + $0xb8] sm:$0xff] }
 0x11d   :  { %1811 = vmatprep.subr.bf16.mxu0 %v1810_v4  ;;  %v1858_v2 = vpack.c.bf16 %v579_v58, %v575_v57  ;;  %v574_v4 = vld [vmem:[%s2915_s13 + $0x90] sm:$0xff]  ;;  %v617_v57 = vld [vmem:[%s2915_s13 + $0x1e8] sm:$0xff]  ;;  %v615_v58 = vld [vmem:[%s2915_s13 + $0x1d8] sm:$0xff] }
 0x11e   :  { %1777 = vmatpush1.bf16.msra.mxu1 %v1776_v55  ;;  %v573_v55 = vld [vmem:[%s2915_s13 + $0x88] sm:$0xff]  ;;  %v1860_v11 = vpack.c.bf16 %v578_v5, %v574_v4 }
 0x11f   :  { %1779 = vmatprep.subr.bf16.mxu1 %v1778_v61  ;;  %v572_v61 = vld [vmem:[%s2915_s13 + $0x80] sm:$0xff]  ;;  %v1826_v63 = vpack.c.bf16 %v577_v56, %v573_v55  ;;  %v613_v55 = vld [vmem:[%s2915_s13 + $0x1c8] sm:$0xff] }
 0x120   :  { %1813 = vmatpush1.bf16.msra.mxu0 %v1812_v9  ;;  %v587_v9 = vld [vmem:[%s2915_s13 + $0xf8] sm:$0xff]  ;;  %v1828_v10 = vpack.c.bf16 %v576_v62, %v572_v61  ;;  %v1846_v6 = vpack.c.bf16 %v617_v57, %v613_v55  ;;  %v1066_v55 = vld [vmem:[%s2920_s19 + $0x70] sm:$0xff] }
 0x121   :  { %1815 = vmatprep.subr.bf16.mxu0 %v1814_v16  ;;  %v586_v16 = vld [vmem:[%s2915_s13 + $0xf0] sm:$0xff]  ;;  %v1067_v57 = vld [vmem:[%s2920_s19 + $0x78] sm:$0xff] }
 0x122   :  { %1781 = vmatpush1.bf16.msra.mxu1 %v1780_v8  ;;  %v583_v8 = vld [vmem:[%s2915_s13 + $0xd8] sm:$0xff]  ;;  %v1864_v22 = vpack.c.bf16 %v586_v16, %v582_v15  ;;  %v1028_v15 = vld [vmem:[%s2921_s18] sm:$0xff]  ;;  %v1029_v16 = vld [vmem:[%s2921_s18 + $0x8] sm:$0xff] }
 0x123   :  { %1783 = vmatprep.subr.bf16.mxu1 %v1782_v13  ;;  %v584_v13 = vld [vmem:[%s2915_s13 + $0xe0] sm:$0xff]  ;;  %v1862_v14 = vpack.c.bf16 %v587_v9, %v583_v8  ;;  %v614_v9 = vld [vmem:[%s2915_s13 + $0x1d0] sm:$0xff] }
 0x124   :  { %1817 = vmatpush1.bf16.msra.mxu0 %v1816_v20  ;;  %v595_v20 = vld [vmem:[%s2915_s13 + $0x138] sm:$0xff]  ;;  %v1832_v21 = vpack.c.bf16 %v584_v13, %v580_v12  ;;  %v616_v8 = vld [vmem:[%s2915_s13 + $0x1e0] sm:$0xff] }
 0x125   :  { %1851 = vmatprep.subr.bf16.mxu0 %v1850_v26  ;;  %v1866_v26 = vpack.c.bf16 %v595_v20, %v591_v19  ;;  %v1054_v19 = vld [vmem:[%s2920_s19 + $0x10] sm:$0xff]  ;;  %v1055_v20 = vld [vmem:[%s2920_s19 + $0x18] sm:$0xff] }
 0x126   :  { %1785 = vmatpush1.bf16.msra.mxu1 %v1784_v17  ;;  %v589_v17 = vld [vmem:[%s2915_s13 + $0x108] sm:$0xff] }
 0x127   :  { %1819 = vmatprep.subr.bf16.mxu1 %v1818_v24  ;;  %v592_v24 = vld [vmem:[%s2915_s13 + $0x120] sm:$0xff]  ;;  %v1834_v25 = vpack.c.bf16 %v593_v18, %v589_v17  ;;  %v1907_v18 = vpack.c.bf16 %v1029_v16, %v1028_v15 }
 0x1ba   :  { %v346_v27 = vpop.f32.mrb[2].mxu0 }
 0x1bb   :  { %v1514_v29 = vpop.f32.mrb[3].mxu0 }
 0x1bc   :  { %v268_v30 = vpop.f32.mrb[0].mxu1  ;;  %v597_v29 = vld [vmem:[%s2915_s13 + $0x148] sm:$0xff] }
 0x1bd   :  { %v279_v31 = vmul.f32 %v1323_v28, %v268_v30  ;;  %v1479_v32 = vpop.f32.mrb[1].mxu1  ;;  %v594_v28 = vld [vmem:[%s2915_s13 + $0x130] sm:$0xff]  ;;  %v601_v30 = vld [vmem:[%s2915_s13 + $0x168] sm:$0xff] }
 0x1be   :  { %v603_v32 = vld [vmem:[%s2915_s13 + $0x178] sm:$0xff]  ;;  %v1838_v37 = vpack.c.bf16 %v601_v30, %v597_v29  ;;  %v1058_v30 = vld [vmem:[%s2920_s19 + $0x30] sm:$0xff] }
 0x1bf   :  { %v347_v34 = vadd.f32 %v346_v27, %v279_v31  ;;  %v590_v27 = vld [vmem:[%s2915_s13 + $0x110] sm:$0xff]  ;;  %v599_v31 = vld [vmem:[%s2915_s13 + $0x158] sm:$0xff] }
 0x1c1   :  { %v357_v38 = vadd.f32 %v1324_v33, %v347_v34  ;;  %v1836_v33 = vpack.c.bf16 %v592_v24, %v588_v23  ;;  %v1868_v34 = vpack.c.bf16 %v594_v28, %v590_v27  ;;  %v1886_v23 = vpack.c.bf16 %v1055_v20, %v1054_v19  ;;  %v1033_v27 = vld [vmem:[%s2921_s18 + $0x28] sm:$0xff] }
 0x1c3   :  { %v2575_v45 = vmax.f32 %v357_v38, 0.0  ;;  %v1870_v38 = vpack.c.bf16 %v603_v32, %v599_v31  ;;  %v1059_v31 = vld [vmem:[%s2920_s19 + $0x38] sm:$0xff] }
 0x1c4   :  { %v1035_v32 = vld [vmem:[%s2921_s18 + $0x38] sm:$0xff] }
 0x1c5   :  { %v627_v50 = vmul.f32 %v1328_v35, %v2575_v45  ;;  %v596_v35 = vld [vmem:[%s2915_s13 + $0x140] sm:$0xff] }
 0x1c7   :  { %757 = vmatmul.mubr.f32.vlgmr.msra.gmra.mrb[4].mxu1 %v627_v50  ;;  %828 = vmatmul.mubr.f32.vlgmr.msra.gmra.mrb[6].mxu0 %v627_v50  ;;  %v608_v50 = vld [vmem:[%s2915_s13 + $0x1a0] sm:$0xff] }
 0x1c8   :  { %1821 = vmatpush1.bf16.msra.mxu1 %v1820_v46  ;;  %1853 = vmatpush1.bf16.msra.mxu0 %v1852_v47  ;;  %v1326_v46 = vld [vmem:[%s2919_s11] ss:$0 sm:$0xff]  ;;  %v1840_v47 = vpack.c.bf16 %v600_v36, %v596_v35  ;;  %v1844_v62 = vpack.c.bf16 %v608_v50, %v604_v49  ;;  %v1061_v36 = vld [vmem:[%s2920_s19 + $0x48] sm:$0xff] }
 0x1c9   :  { %1823 = vmatprep.subr.bf16.mxu1 %v1822_v51  ;;  %1855 = vmatprep.subr.bf16.mxu0 %v1854_v52  ;;  %v1842_v51 = vpack.c.bf16 %v609_v42, %v605_v41  ;;  %v1874_v52 = vpack.c.bf16 %v611_v44, %v607_v43  ;;  %v1060_v35 = vld [vmem:[%s2920_s19 + $0x40] sm:$0xff]  ;;  %v1062_v41 = vld [vmem:[%s2920_s19 + $0x50] sm:$0xff]  ;;  %v1063_v42 = vld [vmem:[%s2920_s19 + $0x58] sm:$0xff] }
 0x1ca   :  { %924 = vmatprep.mubr.f32.mxu1 %v1951_v3  ;;  %995 = vmatprep.mubr.f32.mxu0 %v1951_v3  ;;  %v1895_v39 = vpack.c.bf16 %v1061_v36, %v1060_v35  ;;  %v1038_v43 = vld [vmem:[%s2921_s18 + $0x50] sm:$0xff]  ;;  %v1039_v44 = vld [vmem:[%s2921_s18 + $0x58] sm:$0xff]  ;;  %v1065_v49 = vld [vmem:[%s2920_s19 + $0x68] sm:$0xff] }
 0x1cb   :  { %v1040_v50 = vld [vmem:[%s2921_s18 + $0x60] sm:$0xff] }
 0x1cc   :  { %1825 = vmatpush1.bf16.msra.mxu1 %v1824_v59  ;;  %1857 = vmatpush1.bf16.msra.mxu0 %v1856_v60  ;;  %v619_v59 = vld [vmem:[%s2915_s13 + $0x1f8] sm:$0xff] }
 0x1cd   :  { %1827 = vmatprep.subr.bf16.mxu1 %v1826_v63  ;;  %1859 = vmatprep.subr.bf16.mxu0 %v1858_v2  ;;  %v1876_v63 = vpack.c.bf16 %v610_v54, %v606_v53  ;;  %v612_v2 = vld [vmem:[%s2915_s13 + $0x1c0] sm:$0xff]  ;;  %v1878_v7 = vpack.c.bf16 %v619_v59, %v615_v58  ;;  %v1042_v58 = vld [vmem:[%s2921_s18 + $0x70] sm:$0xff]  ;;  %v1043_v59 = vld [vmem:[%s2921_s18 + $0x78] sm:$0xff] }
 0x1ce   :  { %v1848_v12 = vpack.c.bf16 %v616_v8, %v612_v2  ;;  %v836_v8 = vlaneseq }
 0x1d0   :  { %1829 = vmatpush1.bf16.msra.mxu1 %v1828_v10  ;;  %1861 = vmatpush1.bf16.msra.mxu0 %v1860_v11  ;;  %v618_v10 = vld [vmem:[%s2915_s13 + $0x1f0] sm:$0xff] }
 0x1d1   :  { %1831 = vmatprep.subr.bf16.mxu1 %v1830_v1  ;;  %1863 = vmatprep.subr.bf16.mxu0 %v1862_v14  ;;  %v1880_v13 = vpack.c.bf16 %v618_v10, %v614_v9  ;;  %v1052_v1 = vld [vmem:[%s2920_s19] sm:$0xff]  ;;  %v1053_v14 = vld [vmem:[%s2920_s19 + $0x8] sm:$0xff]  ;;  %v837_v9 = vshrl.u32 %v836_v8, 7 }
 0x1d2   :  { %v1883_v17 = vpack.c.bf16 %v1053_v14, %v1052_v1 }
 0x1d3   :  { %v838_v10 = vsub.s32 0, %v837_v9 }
 0x1d4   :  { %1833 = vmatpush1.bf16.msra.mxu1 %v1832_v21  ;;  %1865 = vmatpush1.bf16.msra.mxu0 %v1864_v22  ;;  %v1030_v21 = vld [vmem:[%s2921_s18 + $0x10] sm:$0xff]  ;;  %v1031_v22 = vld [vmem:[%s2921_s18 + $0x18] sm:$0xff] }
 0x1d5   :  { %1835 = vmatprep.subr.bf16.mxu1 %v1834_v25  ;;  %1867 = vmatprep.subr.bf16.mxu0 %v1866_v26  ;;  %v1910_v24 = vpack.c.bf16 %v1031_v22, %v1030_v21  ;;  %v1056_v25 = vld [vmem:[%s2920_s19 + $0x20] sm:$0xff]  ;;  %v1057_v26 = vld [vmem:[%s2920_s19 + $0x28] sm:$0xff] }
 0x1d6   :  { %v1889_v28 = vpack.c.bf16 %v1057_v26, %v1056_v25 }
 0x1d8   :  { %1837 = vmatpush1.bf16.msra.mxu1 %v1836_v33  ;;  %1869 = vmatpush1.bf16.msra.mxu0 %v1868_v34  ;;  %v1892_v33 = vpack.c.bf16 %v1059_v31, %v1058_v30 }
 0x1d9   :  { %1839 = vmatprep.subr.bf16.mxu1 %v1838_v37  ;;  %1871 = vmatprep.subr.bf16.mxu0 %v1870_v38  ;;  %v1036_v37 = vld [vmem:[%s2921_s18 + $0x40] sm:$0xff]  ;;  %v1037_v38 = vld [vmem:[%s2921_s18 + $0x48] sm:$0xff] }
 0x1da   :  { %v543_v56 = vpop.f32.mrb[4].mxu0  ;;  %v1919_v40 = vpack.c.bf16 %v1037_v38, %v1036_v37 }
 0x1db   :  { %v1584_v60 = vpop.f32.mrb[5].mxu0 }
 0x1dc   :  { %v465_v61 = vpop.f32.mrb[2].mxu1  ;;  %1841 = vmatpush1.bf16.msra.mxu1 %v1840_v47  ;;  %1873 = vmatpush1.bf16.msra.mxu0 %v1872_v48  ;;  %v1922_v47 = vpack.c.bf16 %v1039_v44, %v1038_v43  ;;  %v1064_v48 = vld [vmem:[%s2920_s19 + $0x60] sm:$0xff]  ;;  %v1904_v60 = vpack.c.bf16 %v1067_v57, %v1066_v55 }
 0x1dd   :  { %v476_v4 = vmul.f32 %v1326_v46, %v465_v61  ;;  %v1549_v5 = vpop.f32.mrb[3].mxu1  ;;  %1843 = vmatprep.subr.bf16.mxu1 %v1842_v51  ;;  %1875 = vmatprep.subr.bf16.mxu0 %v1874_v52  ;;  %v1898_v46 = vpack.c.bf16 %v1063_v42, %v1062_v41  ;;  %v1041_v51 = vld [vmem:[%s2921_s18 + $0x68] sm:$0xff]  ;;  %v1327_v52 = vld [vmem:[%s2922_s12] ss:$0 sm:$0xff]  ;;  %v1901_v53 = vpack.c.bf16 %v1065_v49, %v1064_v48 }
 0x1de   :  { %v1925_v54 = vpack.c.bf16 %v1041_v51, %v1040_v50  ;;  %v1928_v61 = vpack.c.bf16 %v1043_v59, %v1042_v58 }
 0x1df   :  { %v2739_v11 = vadd.f32 %v543_v56, %v476_v4 }
 0x1e0   :  { %1845 = vmatpush1.bf16.msra.mxu1 %v1844_v62  ;;  %1877 = vmatpush1.bf16.msra.mxu0 %v1876_v63  ;;  %v1329_v63 = vld [vmem:[%s2923_s20] ss:$0 sm:$0xff] }
 0x1e1   :  { %1847 = vmatprep.subr.bf16.mxu1 %v1846_v6  ;;  %1879 = vmatprep.subr.bf16.mxu0 %v1878_v7  ;;  %v554_v56 = vadd.f32 %v1327_v52, %v2739_v11  ;;  %v846_v11 = vsub.s32 2, %v837_v9 }
 0x1e3   :  { %v555_v62 = vmax.f32 %v554_v56, 0.0 }
 0x1e4   :  { %1849 = vmatpush1.bf16.msra.mxu1 %v1848_v12  ;;  %1881 = vmatpush1.bf16.msra.mxu0 %v1880_v13  ;;  %v842_v12 = vsub.s32 1, %v837_v9  ;;  %v850_v13 = vsub.s32 3, %v837_v9 }
 0x1e5   :  { %1882 = vmatprep.subr.bf16.mxu1 %v1949_v0  ;;  %1906 = vmatprep.subr.bf16.mxu0 %v1949_v0  ;;  %v1051_v2 = vmul.f32 %v1329_v63, %v555_v62 }
 0x1e7   :  { %925 = vmatmul.mubr.f32.vlgmr.msra.gmra.mrb[6].mxu1 %v2575_v45  ;;  %996 = vmatmul.mubr.f32.vlgmr.msra.gmra.mrb[8].mxu0 %v2575_v45  ;;  %v1032_v45 = vld [vmem:[%s2921_s18 + $0x20] sm:$0xff] }
 0x1e8   :  { %1884 = vmatpush3.bf16.msra.mxu1 %v1883_v17  ;;  %1908 = vmatpush3.bf16.msra.mxu0 %v1907_v18  ;;  %v1913_v29 = vpack.c.bf16 %v1033_v27, %v1032_v45  ;;  %v1002_v17 = vld [vmem:[%s2925_s17] sm:$0xf] }
 0x1e9   :  { %1885 = vmatprep.subr.bf16.mxu1 %v1949_v0  ;;  %1909 = vmatprep.subr.bf16.mxu0 %v1949_v0  ;;  %v1007_v20 = vrot.slane %v1002_v17, %v838_v10  ;;  %v1011_v25 = vrot.slane %v1002_v17, %v842_v12 }
 0x1ea   :  { %1617 = vmatprep.mubr.msk.f32.mxu1 %vm1950_vm0, %v1951_v3  ;;  %1652 = vmatprep.mubr.msk.f32.mxu0 %vm1950_vm0, %v1951_v3  ;;  %v1034_v3 = vld [vmem:[%s2921_s18 + $0x30] sm:$0xff] }
 0x1eb   :  { %v1916_v34 = vpack.c.bf16 %v1035_v32, %v1034_v3 }
 0x1ec   :  { %1887 = vmatpush3.bf16.msra.mxu1 %v1886_v23  ;;  %1911 = vmatpush3.bf16.msra.mxu0 %v1910_v24 }
 0x1ed   :  { %1888 = vmatprep.subr.bf16.mxu1 %v1949_v0  ;;  %1912 = vmatprep.subr.bf16.mxu0 %v1949_v0 }
 0x1f0   :  { %1890 = vmatpush3.bf16.msra.mxu1 %v1889_v28  ;;  %1914 = vmatpush3.bf16.msra.mxu0 %v1913_v29  ;;  %v1015_v29 = vrot.slane %v1002_v17, %v846_v11 }
 0x1f1   :  { %1891 = vmatprep.subr.bf16.mxu1 %v1949_v0  ;;  %1915 = vmatprep.subr.bf16.mxu0 %v1949_v0 }
 0x1f4   :  { %1893 = vmatpush3.bf16.msra.mxu1 %v1892_v33  ;;  %1917 = vmatpush3.bf16.msra.mxu0 %v1916_v34  ;;  %v1019_v33 = vrot.slane %v1002_v17, %v850_v13 }
 0x1f5   :  { %1894 = vmatprep.subr.bf16.mxu1 %v1949_v0  ;;  %1918 = vmatprep.subr.bf16.mxu0 %v1949_v0 }
 0x1f8   :  { %1896 = vmatpush3.bf16.msra.mxu1 %v1895_v39  ;;  %1920 = vmatpush3.bf16.msra.mxu0 %v1919_v40  ;;  %v1330_v39 = vld [vmem:[%s2926_s21] ss:$0 sm:$0xff] }
 0x1f9   :  { %1897 = vmatprep.subr.bf16.mxu1 %v1949_v0  ;;  %1921 = vmatprep.subr.bf16.mxu0 %v1949_v0 }
 0x1fc   :  { %1899 = vmatpush3.bf16.msra.mxu1 %v1898_v46  ;;  %1923 = vmatpush3.bf16.msra.mxu0 %v1922_v47  ;;  %v1331_v46 = vld [vmem:[%s2927_s22] ss:$0 sm:$0xff] }
 0x1fd   :  { %1900 = vmatprep.subr.bf16.mxu1 %v1949_v0  ;;  %1924 = vmatprep.subr.bf16.mxu0 %v1949_v0 }
 0x200   :  { %1902 = vmatpush3.bf16.msra.mxu1 %v1901_v53  ;;  %1926 = vmatpush3.bf16.msra.mxu0 %v1925_v54 }
 0x201   :  { %1903 = vmatprep.subr.bf16.mxu1 %v1949_v0  ;;  %1927 = vmatprep.subr.bf16.mxu0 %v1949_v0  ;;  %v834_v0 = vld [vmem:[%s2924_s16] sm:$0xf] }
 0x202   :  { %v839_v1 = vrot.slane %v834_v0, %v838_v10  ;;  %v847_v14 = vrot.slane %v834_v0, %v846_v11  ;;  %v843_v15 = vrot.slane %v834_v0, %v842_v12  ;;  %v851_v16 = vrot.slane %v834_v0, %v850_v13 }
 0x204   :  { %1905 = vmatpush3.bf16.msra.mxu1 %v1904_v60  ;;  %1929 = vmatpush3.bf16.msra.mxu0 %v1928_v61 }
 0x207   :  { %1618 = vmatmul.mubr.f32.vlgmr.msra.gmra.mrb[8].mxu1 %v1051_v2  ;;  %1653 = vmatmul.mubr.f32.vlgmr.msra.gmra.mrb[10].mxu0 %v555_v62 }
 0x29a   :  { %v758_v4 = vpop.f32.mrb[4].mxu1  ;;  %v829_v5 = vpop.f32.mrb[6].mxu0 }
 0x29b   :  { %v760_v6 = vpop.f32.mrb[5].mxu1  ;;  %v831_v7 = vpop.f32.mrb[7].mxu0  ;;  %v856_v18 = vmul.f32 %v839_v1, %v758_v4  ;;  %v858_v19 = vmul.f32 %v847_v14, %v829_v5 }
 0x29c   :  { %v857_v21 = vmul.f32 %v843_v15, %v760_v6  ;;  %v859_v22 = vmul.f32 %v851_v16, %v831_v7 }
 0x2ba   :  { %v926_v23 = vpop.f32.mrb[6].mxu1  ;;  %v997_v24 = vpop.f32.mrb[8].mxu0 }
 0x2bb   :  { %v927_v26 = vadd.f32 %v926_v23, %v856_v18  ;;  %v998_v45 = vadd.f32 %v997_v24, %v858_v19  ;;  %v928_v27 = vpop.f32.mrb[7].mxu1  ;;  %v999_v28 = vpop.f32.mrb[9].mxu0 }
 0x2bc   :  { %v929_v30 = vadd.f32 %v928_v27, %v857_v21  ;;  %v1000_v31 = vadd.f32 %v999_v28, %v859_v22 }
 0x2bd   :  { %v1024_v3 = vadd.f32 %v1007_v20, %v927_v26  ;;  %v1026_v34 = vadd.f32 %v1015_v29, %v998_v45 }
 0x2be   :  { %v1025_v32 = vadd.f32 %v1011_v25, %v929_v30  ;;  %v1027_v36 = vadd.f32 %v1019_v33, %v1000_v31  ;;  %v1332_v25 = vld [vmem:[%s2928_s23] ss:$0 sm:$0xff] }
 0x2c0   :  { %v1225_v35 = vadd.f32 %v1025_v32, %v1024_v3 }
 0x2c2   :  { %v1226_v37 = vadd.f32 %v1225_v35, %v1026_v34 }
 0x2c4   :  { %v1227_v38 = vadd.f32 %v1226_v37, %v1027_v36 }
 0x2c6   :  { %v1228_v49 = vmul.f32 0.25, %v1227_v38 }
 0x2da   :  { %v1134_v40 = vpop.f32.mrb[8].mxu1  ;;  %v1212_v41 = vpop.f32.mrb[10].mxu0 }
 0x2db   :  { %v1145_v42 = vmul.f32 %v1330_v39, %v1134_v40  ;;  %v1619_v43 = vpop.f32.mrb[9].mxu1  ;;  %v1654_v44 = vpop.f32.mrb[11].mxu0 }
 0x2dd   :  { %v1213_v47 = vadd.f32 %v1212_v41, %v1145_v42 }
 0x2df   :  { %v1223_v48 = vadd.f32 %v1331_v46, %v1213_v47 }
 0x2e1   :  { %v1272_v50 = vadd.f32 %v1223_v48, %v1026_v34  ;;  %v1229_v51 = vadd.f32 %v1223_v48, %v1024_v3  ;;  %v1290_v52 = vadd.f32 %v1223_v48, %v1027_v36  ;;  %v1254_v53 = vadd.f32 %v1223_v48, %v1025_v32 }
 0x2e3   :  { %v1273_v54 = vsub.f32 %v1272_v50, %v1228_v49  ;;  %v1230_v55 = vsub.f32 %v1229_v51, %v1228_v49  ;;  %v1291_v56 = vsub.f32 %v1290_v52, %v1228_v49  ;;  %v1255_v57 = vsub.f32 %v1254_v53, %v1228_v49 }
 0x2e5   :  { %v1274_v58 = vsel %vm1231_vm2, %v1273_v54, -inf  ;;  %v1232_v59 = vsel %vm1231_vm2, %v1230_v55, -inf  ;;  %v1292_v60 = vsel %vm1231_vm2, %v1291_v56, -inf  ;;  %v1256_v61 = vsel %vm1231_vm2, %v1255_v57, -inf }
 0x2e6   :  { %1275 = vmax.xlane.f32.xlu1 %v1274_v58  ;;  %1233 = vmax.xlane.f32.xlu0 %v1232_v59 }
 0x2ea   :  { %1293 = vmax.xlane.f32.xlu1 %v1292_v60  ;;  %1257 = vmax.xlane.f32.xlu0 %v1256_v61 }
 0x373   :  { %v1276_v62 = vpop.xlane.xlu1 %1275  ;;  %v1234_v63 = vpop.xlane.xlu0 %1233 }
 0x374   :  { %v1277_v2 = vsub.f32 %v1273_v54, %v1276_v62  ;;  %v1235_v4 = vsub.f32 %v1230_v55, %v1234_v63 }
 0x376   :  { %v1236_v5 = vmul.f32 1.442695, %v1235_v4  ;;  %v1278_v6 = vmul.f32 1.442695, %v1277_v2 }
 0x377   :  { %v1294_v7 = vpop.xlane.xlu1 %1293  ;;  %v1258_v8 = vpop.xlane.xlu0 %1257 }
 0x378   :  { %v1295_v9 = vsub.f32 %v1291_v56, %v1294_v7  ;;  %v1259_v10 = vsub.f32 %v1255_v57, %v1258_v8  ;;  %1933 = vpow2.f32 %v1236_v5 }
 0x379   :  { %1935 = vpow2.f32 %v1278_v6 }
 0x37a   :  { %v1260_v11 = vmul.f32 1.442695, %v1259_v10  ;;  %v1296_v0 = vmul.f32 1.442695, %v1295_v9 }
 0x37c   :  { %1937 = vpow2.f32 %v1260_v11 }
 0x37d   :  { %1939 = vpow2.f32 %v1296_v0 }
 0x382   :  { %v1934_v12 = vpop.eup %1933 }
 0x383   :  { %v1238_v13 = vsel %vm1231_vm2, %v1934_v12, 0.0  ;;  %v1936_v1 = vpop.eup %1935 }
 0x384   :  { %1239 = vadd.xlane.f32.xlu0 %v1238_v13  ;;  %v1280_v15 = vsel %vm1231_vm2, %v1936_v1, 0.0 }
 0x386   :  { %v1938_v14 = vpop.eup %1937 }
 0x387   :  { %v1262_v16 = vsel %vm1231_vm2, %v1938_v14, 0.0  ;;  %v1940_v17 = vpop.eup %1939 }
 0x388   :  { %1281 = vadd.xlane.f32.xlu0 %v1280_v15  ;;  %1263 = vadd.xlane.f32.xlu1 %v1262_v16  ;;  %v1298_v18 = vsel %vm1231_vm2, %v1940_v17, 0.0 }
 0x38c   :  { %1299 = vadd.xlane.f32.xlu1 %v1298_v18 }
 0x411   :  { %v1240_v19 = vpop.xlane.xlu0 %1239 }
 0x412   :  { %1941 = vrcp.f32 %v1240_v19 }
 0x415   :  { %v1264_v20 = vpop.xlane.xlu1 %1263  ;;  %v1282_v21 = vpop.xlane.xlu0 %1281 }
 0x416   :  { %1943 = vrcp.f32 %v1264_v20 }
 0x417   :  { %1945 = vrcp.f32 %v1282_v21 }
 0x419   :  { %v1300_v22 = vpop.xlane.xlu1 %1299 }
 0x41a   :  { %1947 = vrcp.f32 %v1300_v22 }
 0x41c   :  { %v1942_v23 = vpop.eup %1941 }
 0x41d   :  { %v1242_v24 = vmul.f32 %v1942_v23, %v1934_v12 }
 0x41f   :  { %v1243_v26 = vmax.f32 %v1242_v24, 0.001 }
 0x420   :  { %v1944_v45 = vpop.eup %1943 }
 0x421   :  { %v1946_v27 = vpop.eup %1945  ;;  %v1250_v28 = vmul.f32 %v1332_v25, %v1243_v26  ;;  %v1266_v29 = vmul.f32 %v1944_v45, %v1938_v14 }
 0x422   :  { %v1284_v30 = vmul.f32 %v1946_v27, %v1936_v1 }
 0x423   :  { %v1251_v31 = vsel %vm1231_vm2, %v1250_v28, 0.0  ;;  %v1267_v3 = vmax.f32 %v1266_v29, 0.001 }
 0x424   :  { %v1948_v32 = vpop.eup %1947  ;;  %1252 = vadd.xlane.f32.xlu0 %v1251_v31  ;;  %v1285_v33 = vmax.f32 %v1284_v30, 0.001 }
 0x425   :  { %v1268_v34 = vmul.f32 %v1332_v25, %v1267_v3  ;;  %v1302_v35 = vmul.f32 %v1948_v32, %v1940_v17 }
 0x426   :  { %v1286_v36 = vmul.f32 %v1332_v25, %v1285_v33 }
 0x427   :  { %v1269_v37 = vsel %vm1231_vm2, %v1268_v34, 0.0  ;;  %v1303_v38 = vmax.f32 %v1302_v35, 0.001 }
 0x428   :  { %1270 = vadd.xlane.f32.xlu1 %v1269_v37  ;;  %v1287_v39 = vsel %vm1231_vm2, %v1286_v36, 0.0 }
 0x429   :  { %1288 = vadd.xlane.f32.xlu0 %v1287_v39  ;;  %v1304_v40 = vmul.f32 %v1332_v25, %v1303_v38 }
 0x42b   :  { %v1305_v41 = vsel %vm1231_vm2, %v1304_v40, 0.0 }
 0x42c   :  { %1306 = vadd.xlane.f32.xlu1 %v1305_v41 }
 0x4b1   :  { %v1253_v42 = vpop.xlane.xlu0 %1252 }
 0x4b2   :  { %1309 = vst.msk [vmem:[%s2929_s24] sm:$0xff] %vm1308_vm3, %v1253_v42 }
 0x4b5   :  { %v1271_v43 = vpop.xlane.xlu1 %1270 }
 0x4b6   :  { %1311 = vst.msk [vmem:[%s2929_s24] sm:$0xff] %vm1310_vm4, %v1271_v43  ;;  %v1289_v44 = vpop.xlane.xlu0 %1288 }
 0x4b7   :  { %1313 = vst.msk [vmem:[%s2929_s24] sm:$0xff] %vm1312_vm5, %v1289_v44 }
 0x4b9   :  { %v1307_v46 = vpop.xlane.xlu1 %1306 }
 0x4ba   :  { %1315 = vst.msk [vmem:[%s2929_s24] sm:$0xff] %vm1314_vm6, %v1307_v46 }

</bundles_post_ra>
